<compile_context>
chip_gen: v7x
topology: tpu7x:2x2x1
jax: 0.10.0
libtpu: 0.0.40
codegen_flags: <defaults>
</compile_context>

<pallas_src>
import functools

import jax
import jax.numpy as jnp
from jax.experimental import pallas as pl
from jax.experimental.pallas import tpu as pltpu


# ---------------------------------------------------------------------------
# Fused kernel: one batch element per grid step, everything stays in VMEM.
# ---------------------------------------------------------------------------
def _cbam_fused_kernel(x_ref, w1t_ref, w2_ref, wconv_ref, o_ref, mp_ref, *,
                       C, H, W, K):
    HW = H * W
    pad = (K - 1) // 2
    lpad = pad * W + pad            # zero margin covering every conv shift

    x = x_ref[0]                                        # (C, HW) lane-dense

    # ---- channel attention (global avg/max pool + shared 2-layer MLP) -----
    avg = jnp.mean(x, axis=1, keepdims=True)            # (C, 1)
    mx = jnp.max(x, axis=1, keepdims=True)              # (C, 1)

    w1t = w1t_ref[...]                                  # (C, Cr)  == fc1.T
    w2 = w2_ref[...]                                    # (C, Cr)  == fc2

    def mlp(vcol):                                      # vcol: (C, 1)
        h = jnp.sum(w1t * vcol, axis=0, keepdims=True)  # (1, Cr)  fc1
        h = jnp.maximum(h, 0.0)                         # relu
        return jnp.sum(w2 * h, axis=1, keepdims=True)   # (C, 1)  fc2

    attn_ch = jax.nn.sigmoid(mlp(avg) + mlp(mx))        # (C, 1)
    y = x * attn_ch                                     # (C, HW)

    # ---- channel-wise mean / max maps for the spatial attention ------------
    ch_mean = jnp.mean(y, axis=0, keepdims=True)        # (1, HW)
    ch_max = jnp.max(y, axis=0, keepdims=True)          # (1, HW)

    # Zero-margin flattened maps in VMEM scratch (never touch HBM).
    mp_ref[...] = jnp.zeros_like(mp_ref)
    mp_ref[0:1, lpad:lpad + HW] = ch_mean
    mp_ref[1:2, lpad:lpad + HW] = ch_max
    mp = mp_ref[...]                                    # (2, HW + 2*lpad)
    rows = [mp[c:c + 1, :] for c in range(2)]

    # Column index (for dx validity); row validity handled by the zero margin.
    col = jax.lax.broadcasted_iota(jnp.int32, (1, HW), 1) % W

    # 7x7 "same" conv (2 -> 1 channel) as lane shifts + FMAs; the column mask
    # is applied once per dx (7x) instead of once per tap (98x).
    acc = jnp.zeros((1, HW), jnp.float32)
    for dx in range(K):
        mask = ((col >= (pad - dx)) &
                (col <= (W - 1 + pad - dx))).astype(jnp.float32)
        part = jnp.zeros((1, HW), jnp.float32)
        for c in range(2):
            row = rows[c]                               # (1, HW + 2*lpad)
            for dy in range(K):
                wgt = wconv_ref[c * K * K + dy * K + dx]        # SMEM scalar
                start = lpad + (dy - pad) * W + (dx - pad)
                part = part + wgt * row[:, start:start + HW]
        acc = acc + mask * part

    attn_sp = jax.nn.sigmoid(acc)                       # (1, HW)
    o_ref[0] = y * attn_sp                              # lane-dense store


# ---------------------------------------------------------------------------
# Wrapper
# ---------------------------------------------------------------------------
def cbam_pallas(x, w1, w2, wconv):
    """x: (N, C, H, W) f32; w1: (C//r, C); w2: (C, C//r); wconv: (1, 2, 7, 7)."""
    N, C, H, W = x.shape
    Cr = w1.shape[0]
    K = wconv.shape[-1]
    HW = H * W
    pad = (K - 1) // 2
    lpad = pad * W + pad

    x_flat = x.reshape(N, C, HW).astype(jnp.float32)    # lane-dense layout
    w1t = jnp.transpose(w1).astype(jnp.float32)         # (C, Cr)
    w2f = w2.astype(jnp.float32)                        # (C, Cr)
    wconv_flat = wconv.reshape(-1).astype(jnp.float32)  # (2*K*K,), OIHW order

    out_flat = pl.pallas_call(
        functools.partial(_cbam_fused_kernel, C=C, H=H, W=W, K=K),
        out_shape=jax.ShapeDtypeStruct((N, C, HW), jnp.float32),
        grid=(N,),
        in_specs=[
            pl.BlockSpec((1, C, HW), lambda b: (b, 0, 0)),
            pl.BlockSpec((C, Cr), lambda b: (0, 0)),
            pl.BlockSpec((C, Cr), lambda b: (0, 0)),
            pl.BlockSpec(memory_space=pltpu.MemorySpace.SMEM),
        ],
        out_specs=pl.BlockSpec((1, C, HW), lambda b: (b, 0, 0)),
        scratch_shapes=[pltpu.VMEM((2, HW + 2 * lpad), jnp.float32)],
        compiler_params=pltpu.CompilerParams(
            dimension_semantics=("parallel",)),
    )(x_flat, w1t, w2f, wconv_flat)

    return out_flat.reshape(N, C, H, W)


# ---------------------------------------------------------------------------
# Pure-JAX reference (mirrors the PyTorch CBAM forward exactly)
# ---------------------------------------------------------------------------
def cbam_reference(x, w1, w2, wconv):
    avg = jnp.mean(x, axis=(2, 3))
    mx = jnp.max(x, axis=(2, 3))

    def mlp(v):
        return jnp.maximum(v @ w1.T, 0.0) @ w2.T

    attn = jax.nn.sigmoid(mlp(avg) + mlp(mx))[:, :, None, None]
    y = x * attn
    ch_mean = jnp.mean(y, axis=1, keepdims=True)
    ch_max = jnp.max(y, axis=1, keepdims=True)
    maps = jnp.concatenate([ch_mean, ch_max], axis=1)
    conv = jax.lax.conv_general_dilated(
        maps, wconv, window_strides=(1, 1), padding=((3, 3), (3, 3)),
        dimension_numbers=("NCHW", "OIHW", "NCHW"))
    return y * jax.nn.sigmoid(conv)


if __name__ == "__main__":
    # PViT uses CBAM(channel=3, reduction=3) -> hidden=1 (1x1-conv fc layers).
    N, C, H, W = 2, 3, 16, 16
    reduction = 3
    Cr = C // reduction

    key = jax.random.PRNGKey(0)
    kx, ky, kx1, kx2, kx3, ky1, ky2, ky3 = jax.random.split(key, 8)
    x = jax.random.normal(kx, (N, C, H, W), dtype=jnp.float32)
    y = jax.random.normal(ky, (N, C, H, W), dtype=jnp.float32)

    # Deterministic synthetic parameters (no checkpoint load); cbam_x / cbam_y
    # each have their own weights, mirroring PViT.
    w1_x = 0.3 * jax.random.normal(kx1, (Cr, C), dtype=jnp.float32)          # fc1
    w2_x = 0.3 * jax.random.normal(kx2, (C, Cr), dtype=jnp.float32)          # fc2
    wc_x = 0.1 * jax.random.normal(kx3, (1, 2, 7, 7), dtype=jnp.float32)     # 7x7
    w1_y = 0.3 * jax.random.normal(ky1, (Cr, C), dtype=jnp.float32)
    w2_y = 0.3 * jax.random.normal(ky2, (C, Cr), dtype=jnp.float32)
    wc_y = 0.1 * jax.random.normal(ky3, (1, 2, 7, 7), dtype=jnp.float32)

    out_x = jax.block_until_ready(cbam_pallas(x, w1_x, w2_x, wc_x))
    out_y = jax.block_until_ready(cbam_pallas(y, w1_y, w2_y, wc_y))

    ref_x = cbam_reference(x, w1_x, w2_x, wc_x)
    ref_y = cbam_reference(y, w1_y, w2_y, wc_y)

    assert out_x.shape == (N, C, H, W) and out_y.shape == (N, C, H, W)
    assert jnp.allclose(out_x, ref_x, atol=1e-3, rtol=1e-3), "cbam_x mismatch"
    assert jnp.allclose(out_y, ref_y, atol=1e-3, rtol=1e-3), "cbam_y mismatch"

    print("KERNEL_OK")
</pallas_src>

<mosaic_0001>
module attributes {stable_mosaic.version = 11 : i64} {
  func.func @_cbam_fused_kernel(%arg0: i32, %arg1: memref<1x3x256xf32, #tpu.memory_space<vmem>>, %arg2: memref<3x1xf32, #tpu.memory_space<vmem>>, %arg3: memref<3x1xf32, #tpu.memory_space<vmem>>, %arg4: memref<98xf32, #tpu.memory_space<smem>>, %arg5: memref<1x3x256xf32, #tpu.memory_space<vmem>>, %arg6: memref<2x358xf32, #tpu.memory_space<vmem>>) attributes {dimension_semantics = [#tpu.dimension_semantics<parallel>], iteration_bounds = array<i64: 2>, scalar_prefetch = 0 : i64, scratch_operands = 1 : i64, tpu.core_type = #tpu.core_type<tc>, window_params = [{transform_indices = @transform_0, window_bounds = array<i64: 1, 3, 256>}, {pipeline_mode = #tpu.pipeline_mode<synchronous>, transform_indices = @transform_1, window_bounds = array<i64: 3, 1>}, {pipeline_mode = #tpu.pipeline_mode<synchronous>, transform_indices = @transform_2, window_bounds = array<i64: 3, 1>}, {transform_indices = @transform_3, window_bounds = array<i64: 98>}, {transform_indices = @transform_4, window_bounds = array<i64: 1, 3, 256>}]} {
    %c0 = arith.constant 0 : index
    %c0_0 = arith.constant 0 : index
    %c0_1 = arith.constant 0 : index
    %0 = vector.load %arg1[%c0, %c0_0, %c0_1] : memref<1x3x256xf32, #tpu.memory_space<vmem>>, vector<1x3x256xf32>
    %1 = vector.shape_cast %0 : vector<1x3x256xf32> to vector<3x256xf32>
    %cst = arith.constant dense<0.000000e+00> : vector<3xf32>
    %2 = vector.multi_reduction <add>, %1, %cst [1] : vector<3x256xf32> to vector<3xf32>
    %3 = vector.shape_cast %2 : vector<3xf32> to vector<3x1xf32>
    %cst_2 = arith.constant 2.560000e+02 : f32
    %4 = vector.broadcast %cst_2 : f32 to vector<3x1xf32>
    %5 = arith.divf %3, %4 : vector<3x1xf32>
    %cst_3 = arith.constant dense<0xFF800000> : vector<3xf32>
    %6 = vector.multi_reduction <maximumf>, %1, %cst_3 [1] : vector<3x256xf32> to vector<3xf32>
    %7 = vector.shape_cast %6 : vector<3xf32> to vector<3x1xf32>
    %c0_4 = arith.constant 0 : index
    %c0_5 = arith.constant 0 : index
    %8 = vector.load %arg2[%c0_4, %c0_5] : memref<3x1xf32, #tpu.memory_space<vmem>>, vector<3x1xf32>
    %c0_6 = arith.constant 0 : index
    %c0_7 = arith.constant 0 : index
    %9 = vector.load %arg3[%c0_6, %c0_7] : memref<3x1xf32, #tpu.memory_space<vmem>>, vector<3x1xf32>
    %10 = arith.mulf %8, %5 : vector<3x1xf32>
    %cst_8 = arith.constant dense<0.000000e+00> : vector<1xf32>
    %11 = vector.multi_reduction <add>, %10, %cst_8 [0] : vector<3x1xf32> to vector<1xf32>
    %12 = vector.shape_cast %11 : vector<1xf32> to vector<1x1xf32>
    %cst_9 = arith.constant 0.000000e+00 : f32
    %13 = vector.broadcast %cst_9 : f32 to vector<1x1xf32>
    %14 = arith.maximumf %12, %13 : vector<1x1xf32>
    %15 = vector.broadcast %14 : vector<1x1xf32> to vector<3x1xf32>
    %16 = arith.mulf %9, %15 : vector<3x1xf32>
    %cst_10 = arith.constant dense<0.000000e+00> : vector<3xf32>
    %17 = vector.multi_reduction <add>, %16, %cst_10 [1] : vector<3x1xf32> to vector<3xf32>
    %18 = vector.shape_cast %17 : vector<3xf32> to vector<3x1xf32>
    %19 = arith.mulf %8, %7 : vector<3x1xf32>
    %cst_11 = arith.constant dense<0.000000e+00> : vector<1xf32>
    %20 = vector.multi_reduction <add>, %19, %cst_11 [0] : vector<3x1xf32> to vector<1xf32>
    %21 = vector.shape_cast %20 : vector<1xf32> to vector<1x1xf32>
    %cst_12 = arith.constant 0.000000e+00 : f32
    %22 = vector.broadcast %cst_12 : f32 to vector<1x1xf32>
    %23 = arith.maximumf %21, %22 : vector<1x1xf32>
    %24 = vector.broadcast %23 : vector<1x1xf32> to vector<3x1xf32>
    %25 = arith.mulf %9, %24 : vector<3x1xf32>
    %cst_13 = arith.constant dense<0.000000e+00> : vector<3xf32>
    %26 = vector.multi_reduction <add>, %25, %cst_13 [1] : vector<3x1xf32> to vector<3xf32>
    %27 = vector.shape_cast %26 : vector<3xf32> to vector<3x1xf32>
    %28 = arith.addf %18, %27 : vector<3x1xf32>
    %29 = arith.negf %28 : vector<3x1xf32>
    %30 = math.exp %29 : vector<3x1xf32>
    %cst_14 = arith.constant 1.000000e+00 : f32
    %31 = vector.broadcast %cst_14 : f32 to vector<3x1xf32>
    %32 = arith.addf %31, %30 : vector<3x1xf32>
    %33 = arith.divf %31, %32 : vector<3x1xf32>
    %34 = vector.broadcast %33 : vector<3x1xf32> to vector<3x256xf32>
    %35 = arith.mulf %1, %34 : vector<3x256xf32>
    %cst_15 = arith.constant dense<0.000000e+00> : vector<256xf32>
    %36 = vector.multi_reduction <add>, %35, %cst_15 [0] : vector<3x256xf32> to vector<256xf32>
    %37 = vector.shape_cast %36 : vector<256xf32> to vector<1x256xf32>
    %cst_16 = arith.constant 3.000000e+00 : f32
    %38 = vector.broadcast %cst_16 : f32 to vector<1x256xf32>
    %39 = arith.divf %37, %38 : vector<1x256xf32>
    %cst_17 = arith.constant dense<0xFF800000> : vector<256xf32>
    %40 = vector.multi_reduction <maximumf>, %35, %cst_17 [0] : vector<3x256xf32> to vector<256xf32>
    %41 = vector.shape_cast %40 : vector<256xf32> to vector<1x256xf32>
    %cst_18 = arith.constant 0.000000e+00 : f32
    %42 = vector.broadcast %cst_18 : f32 to vector<2x358xf32>
    %c0_19 = arith.constant 0 : index
    %c0_20 = arith.constant 0 : index
    %43 = vector.load %arg6[%c0_19, %c0_20] : memref<2x358xf32, #tpu.memory_space<vmem>>, vector<2x358xf32>
    tpu.vector_store %arg6[%c0_19, %c0_20], %42 {strides = array<i32>} : memref<2x358xf32, #tpu.memory_space<vmem>>, vector<2x358xf32>,
    %c0_21 = arith.constant 0 : index
    %c51 = arith.constant 51 : index
    %44 = vector.load %arg6[%c0_21, %c51] : memref<2x358xf32, #tpu.memory_space<vmem>>, vector<1x256xf32>
    tpu.vector_store %arg6[%c0_21, %c51], %39 {strides = array<i32>} : memref<2x358xf32, #tpu.memory_space<vmem>>, vector<1x256xf32>,
    %c1 = arith.constant 1 : index
    %c51_22 = arith.constant 51 : index
    %45 = vector.load %arg6[%c1, %c51_22] : memref<2x358xf32, #tpu.memory_space<vmem>>, vector<1x256xf32>
    tpu.vector_store %arg6[%c1, %c51_22], %41 {strides = array<i32>} : memref<2x358xf32, #tpu.memory_space<vmem>>, vector<1x256xf32>,
    %c0_23 = arith.constant 0 : index
    %c0_24 = arith.constant 0 : index
    %46 = vector.load %arg6[%c0_23, %c0_24] : memref<2x358xf32, #tpu.memory_space<vmem>>, vector<2x358xf32>
    %47 = vector.extract_strided_slice %46 {offsets = [0, 0], sizes = [1, 358], strides = [1, 1]} : vector<2x358xf32> to vector<1x358xf32>
    %48 = vector.extract_strided_slice %46 {offsets = [1, 0], sizes = [1, 358], strides = [1, 1]} : vector<2x358xf32> to vector<1x358xf32>
    %49 = tpu.iota {dimensions = array<i32: 1>} : vector<1x256xi32>
    %c16_i32 = arith.constant 16 : i32
    %c0_i32 = arith.constant 0 : i32
    %50 = arith.cmpi eq, %c16_i32, %c0_i32 : i32
    %c1_i32 = arith.constant 1 : i32
    %51 = arith.select %50, %c1_i32, %c16_i32 : i32
    %52 = vector.broadcast %51 : i32 to vector<1x256xi32>
    %53 = arith.remsi %49, %52 : vector<1x256xi32>
    %c0_i32_25 = arith.constant 0 : i32
    %54 = vector.broadcast %c0_i32_25 : i32 to vector<1x256xi32>
    %55 = arith.cmpi ne, %53, %54 : vector<1x256xi32>
    %c0_i32_26 = arith.constant 0 : i32
    %56 = vector.broadcast %c0_i32_26 : i32 to vector<1x256xi32>
    %57 = arith.cmpi slt, %53, %56 : vector<1x256xi32>
    %c0_i32_27 = arith.constant 0 : i32
    %58 = arith.cmpi slt, %51, %c0_i32_27 : i32
    %59 = vector.broadcast %58 : i1 to vector<1x256xi1>
    %60 = vector.broadcast %59 : vector<1x256xi1> to vector<1x256xi1>
    %61 = arith.xori %57, %60 : vector<1x256xi1>
    %62 = arith.andi %61, %55 : vector<1x256xi1>
    %63 = vector.broadcast %51 : i32 to vector<1x256xi32>
    %64 = arith.addi %53, %63 : vector<1x256xi32>
    %65 = arith.select %62, %64, %53 : vector<1x256xi1>, vector<1x256xi32>
    %cst_28 = arith.constant 0.000000e+00 : f32
    %66 = vector.broadcast %cst_28 : f32 to vector<1x256xf32>
    %c3_i32 = arith.constant 3 : i32
    %67 = vector.broadcast %c3_i32 : i32 to vector<1x256xi32>
    %68 = arith.cmpi sge, %65, %67 : vector<1x256xi32>
    %c18_i32 = arith.constant 18 : i32
    %69 = vector.broadcast %c18_i32 : i32 to vector<1x256xi32>
    %70 = arith.cmpi sle, %65, %69 : vector<1x256xi32>
    %71 = arith.andi %68, %70 : vector<1x256xi1>
    %72 = arith.extui %71 : vector<1x256xi1> to vector<1x256xi32>
    %73 = arith.sitofp %72 : vector<1x256xi32> to vector<1x256xf32>
    %cst_29 = arith.constant 0.000000e+00 : f32
    %74 = vector.broadcast %cst_29 : f32 to vector<1x256xf32>
    %c0_30 = arith.constant 0 : index
    %75 = memref.load %arg4[%c0_30] : memref<98xf32, #tpu.memory_space<smem>>
    %76 = vector.extract_strided_slice %47 {offsets = [0, 0], sizes = [1, 256], strides = [1, 1]} : vector<1x358xf32> to vector<1x256xf32>
    %77 = vector.broadcast %75 : f32 to vector<1x256xf32>
    %78 = arith.mulf %77, %76 : vector<1x256xf32>
    %79 = arith.addf %74, %78 : vector<1x256xf32>
    %c7 = arith.constant 7 : index
    %80 = memref.load %arg4[%c7] : memref<98xf32, #tpu.memory_space<smem>>
    %81 = vector.extract_strided_slice %47 {offsets = [0, 16], sizes = [1, 256], strides = [1, 1]} : vector<1x358xf32> to vector<1x256xf32>
    %82 = vector.broadcast %80 : f32 to vector<1x256xf32>
    %83 = arith.mulf %82, %81 : vector<1x256xf32>
    %84 = arith.addf %79, %83 : vector<1x256xf32>
    %c14 = arith.constant 14 : index
    %85 = memref.load %arg4[%c14] : memref<98xf32, #tpu.memory_space<smem>>
    %86 = vector.extract_strided_slice %47 {offsets = [0, 32], sizes = [1, 256], strides = [1, 1]} : vector<1x358xf32> to vector<1x256xf32>
    %87 = vector.broadcast %85 : f32 to vector<1x256xf32>
    %88 = arith.mulf %87, %86 : vector<1x256xf32>
    %89 = arith.addf %84, %88 : vector<1x256xf32>
    %c21 = arith.constant 21 : index
    %90 = memref.load %arg4[%c21] : memref<98xf32, #tpu.memory_space<smem>>
    %91 = vector.extract_strided_slice %47 {offsets = [0, 48], sizes = [1, 256], strides = [1, 1]} : vector<1x358xf32> to vector<1x256xf32>
    %92 = vector.broadcast %90 : f32 to vector<1x256xf32>
    %93 = arith.mulf %92, %91 : vector<1x256xf32>
    %94 = arith.addf %89, %93 : vector<1x256xf32>
    %c28 = arith.constant 28 : index
    %95 = memref.load %arg4[%c28] : memref<98xf32, #tpu.memory_space<smem>>
    %96 = vector.extract_strided_slice %47 {offsets = [0, 64], sizes = [1, 256], strides = [1, 1]} : vector<1x358xf32> to vector<1x256xf32>
    %97 = vector.broadcast %95 : f32 to vector<1x256xf32>
    %98 = arith.mulf %97, %96 : vector<1x256xf32>
    %99 = arith.addf %94, %98 : vector<1x256xf32>
    %c35 = arith.constant 35 : index
    %100 = memref.load %arg4[%c35] : memref<98xf32, #tpu.memory_space<smem>>
    %101 = vector.extract_strided_slice %47 {offsets = [0, 80], sizes = [1, 256], strides = [1, 1]} : vector<1x358xf32> to vector<1x256xf32>
    %102 = vector.broadcast %100 : f32 to vector<1x256xf32>
    %103 = arith.mulf %102, %101 : vector<1x256xf32>
    %104 = arith.addf %99, %103 : vector<1x256xf32>
    %c42 = arith.constant 42 : index
    %105 = memref.load %arg4[%c42] : memref<98xf32, #tpu.memory_space<smem>>
    %106 = vector.extract_strided_slice %47 {offsets = [0, 96], sizes = [1, 256], strides = [1, 1]} : vector<1x358xf32> to vector<1x256xf32>
    %107 = vector.broadcast %105 : f32 to vector<1x256xf32>
    %108 = arith.mulf %107, %106 : vector<1x256xf32>
    %109 = arith.addf %104, %108 : vector<1x256xf32>
    %c49 = arith.constant 49 : index
    %110 = memref.load %arg4[%c49] : memref<98xf32, #tpu.memory_space<smem>>
    %111 = vector.extract_strided_slice %48 {offsets = [0, 0], sizes = [1, 256], strides = [1, 1]} : vector<1x358xf32> to vector<1x256xf32>
    %112 = vector.broadcast %110 : f32 to vector<1x256xf32>
    %113 = arith.mulf %112, %111 : vector<1x256xf32>
    %114 = arith.addf %109, %113 : vector<1x256xf32>
    %c56 = arith.constant 56 : index
    %115 = memref.load %arg4[%c56] : memref<98xf32, #tpu.memory_space<smem>>
    %116 = vector.extract_strided_slice %48 {offsets = [0, 16], sizes = [1, 256], strides = [1, 1]} : vector<1x358xf32> to vector<1x256xf32>
    %117 = vector.broadcast %115 : f32 to vector<1x256xf32>
    %118 = arith.mulf %117, %116 : vector<1x256xf32>
    %119 = arith.addf %114, %118 : vector<1x256xf32>
    %c63 = arith.constant 63 : index
    %120 = memref.load %arg4[%c63] : memref<98xf32, #tpu.memory_space<smem>>
    %121 = vector.extract_strided_slice %48 {offsets = [0, 32], sizes = [1, 256], strides = [1, 1]} : vector<1x358xf32> to vector<1x256xf32>
    %122 = vector.broadcast %120 : f32 to vector<1x256xf32>
    %123 = arith.mulf %122, %121 : vector<1x256xf32>
    %124 = arith.addf %119, %123 : vector<1x256xf32>
    %c70 = arith.constant 70 : index
    %125 = memref.load %arg4[%c70] : memref<98xf32, #tpu.memory_space<smem>>
    %126 = vector.extract_strided_slice %48 {offsets = [0, 48], sizes = [1, 256], strides = [1, 1]} : vector<1x358xf32> to vector<1x256xf32>
    %127 = vector.broadcast %125 : f32 to vector<1x256xf32>
    %128 = arith.mulf %127, %126 : vector<1x256xf32>
    %129 = arith.addf %124, %128 : vector<1x256xf32>
    %c77 = arith.constant 77 : index
    %130 = memref.load %arg4[%c77] : memref<98xf32, #tpu.memory_space<smem>>
    %131 = vector.extract_strided_slice %48 {offsets = [0, 64], sizes = [1, 256], strides = [1, 1]} : vector<1x358xf32> to vector<1x256xf32>
    %132 = vector.broadcast %130 : f32 to vector<1x256xf32>
    %133 = arith.mulf %132, %131 : vector<1x256xf32>
    %134 = arith.addf %129, %133 : vector<1x256xf32>
    %c84 = arith.constant 84 : index
    %135 = memref.load %arg4[%c84] : memref<98xf32, #tpu.memory_space<smem>>
    %136 = vector.extract_strided_slice %48 {offsets = [0, 80], sizes = [1, 256], strides = [1, 1]} : vector<1x358xf32> to vector<1x256xf32>
    %137 = vector.broadcast %135 : f32 to vector<1x256xf32>
    %138 = arith.mulf %137, %136 : vector<1x256xf32>
    %139 = arith.addf %134, %138 : vector<1x256xf32>
    %c91 = arith.constant 91 : index
    %140 = memref.load %arg4[%c91] : memref<98xf32, #tpu.memory_space<smem>>
    %141 = vector.extract_strided_slice %48 {offsets = [0, 96], sizes = [1, 256], strides = [1, 1]} : vector<1x358xf32> to vector<1x256xf32>
    %142 = vector.broadcast %140 : f32 to vector<1x256xf32>
    %143 = arith.mulf %142, %141 : vector<1x256xf32>
    %144 = arith.addf %139, %143 : vector<1x256xf32>
    %145 = arith.mulf %73, %144 : vector<1x256xf32>
    %146 = arith.addf %66, %145 : vector<1x256xf32>
    %c2_i32 = arith.constant 2 : i32
    %147 = vector.broadcast %c2_i32 : i32 to vector<1x256xi32>
    %148 = arith.cmpi sge, %65, %147 : vector<1x256xi32>
    %c17_i32 = arith.constant 17 : i32
    %149 = vector.broadcast %c17_i32 : i32 to vector<1x256xi32>
    %150 = arith.cmpi sle, %65, %149 : vector<1x256xi32>
    %151 = arith.andi %148, %150 : vector<1x256xi1>
    %152 = arith.extui %151 : vector<1x256xi1> to vector<1x256xi32>
    %153 = arith.sitofp %152 : vector<1x256xi32> to vector<1x256xf32>
    %cst_31 = arith.constant 0.000000e+00 : f32
    %154 = vector.broadcast %cst_31 : f32 to vector<1x256xf32>
    %c1_32 = arith.constant 1 : index
    %155 = memref.load %arg4[%c1_32] : memref<98xf32, #tpu.memory_space<smem>>
    %156 = vector.extract_strided_slice %47 {offsets = [0, 1], sizes = [1, 256], strides = [1, 1]} : vector<1x358xf32> to vector<1x256xf32>
    %157 = vector.broadcast %155 : f32 to vector<1x256xf32>
    %158 = arith.mulf %157, %156 : vector<1x256xf32>
    %159 = arith.addf %154, %158 : vector<1x256xf32>
    %c8 = arith.constant 8 : index
    %160 = memref.load %arg4[%c8] : memref<98xf32, #tpu.memory_space<smem>>
    %161 = vector.extract_strided_slice %47 {offsets = [0, 17], sizes = [1, 256], strides = [1, 1]} : vector<1x358xf32> to vector<1x256xf32>
    %162 = vector.broadcast %160 : f32 to vector<1x256xf32>
    %163 = arith.mulf %162, %161 : vector<1x256xf32>
    %164 = arith.addf %159, %163 : vector<1x256xf32>
    %c15 = arith.constant 15 : index
    %165 = memref.load %arg4[%c15] : memref<98xf32, #tpu.memory_space<smem>>
    %166 = vector.extract_strided_slice %47 {offsets = [0, 33], sizes = [1, 256], strides = [1, 1]} : vector<1x358xf32> to vector<1x256xf32>
    %167 = vector.broadcast %165 : f32 to vector<1x256xf32>
    %168 = arith.mulf %167, %166 : vector<1x256xf32>
    %169 = arith.addf %164, %168 : vector<1x256xf32>
    %c22 = arith.constant 22 : index
    %170 = memref.load %arg4[%c22] : memref<98xf32, #tpu.memory_space<smem>>
    %171 = vector.extract_strided_slice %47 {offsets = [0, 49], sizes = [1, 256], strides = [1, 1]} : vector<1x358xf32> to vector<1x256xf32>
    %172 = vector.broadcast %170 : f32 to vector<1x256xf32>
    %173 = arith.mulf %172, %171 : vector<1x256xf32>
    %174 = arith.addf %169, %173 : vector<1x256xf32>
    %c29 = arith.constant 29 : index
    %175 = memref.load %arg4[%c29] : memref<98xf32, #tpu.memory_space<smem>>
    %176 = vector.extract_strided_slice %47 {offsets = [0, 65], sizes = [1, 256], strides = [1, 1]} : vector<1x358xf32> to vector<1x256xf32>
    %177 = vector.broadcast %175 : f32 to vector<1x256xf32>
    %178 = arith.mulf %177, %176 : vector<1x256xf32>
    %179 = arith.addf %174, %178 : vector<1x256xf32>
    %c36 = arith.constant 36 : index
    %180 = memref.load %arg4[%c36] : memref<98xf32, #tpu.memory_space<smem>>
    %181 = vector.extract_strided_slice %47 {offsets = [0, 81], sizes = [1, 256], strides = [1, 1]} : vector<1x358xf32> to vector<1x256xf32>
    %182 = vector.broadcast %180 : f32 to vector<1x256xf32>
    %183 = arith.mulf %182, %181 : vector<1x256xf32>
    %184 = arith.addf %179, %183 : vector<1x256xf32>
    %c43 = arith.constant 43 : index
    %185 = memref.load %arg4[%c43] : memref<98xf32, #tpu.memory_space<smem>>
    %186 = vector.extract_strided_slice %47 {offsets = [0, 97], sizes = [1, 256], strides = [1, 1]} : vector<1x358xf32> to vector<1x256xf32>
    %187 = vector.broadcast %185 : f32 to vector<1x256xf32>
    %188 = arith.mulf %187, %186 : vector<1x256xf32>
    %189 = arith.addf %184, %188 : vector<1x256xf32>
    %c50 = arith.constant 50 : index
    %190 = memref.load %arg4[%c50] : memref<98xf32, #tpu.memory_space<smem>>
    %191 = vector.extract_strided_slice %48 {offsets = [0, 1], sizes = [1, 256], strides = [1, 1]} : vector<1x358xf32> to vector<1x256xf32>
    %192 = vector.broadcast %190 : f32 to vector<1x256xf32>
    %193 = arith.mulf %192, %191 : vector<1x256xf32>
    %194 = arith.addf %189, %193 : vector<1x256xf32>
    %c57 = arith.constant 57 : index
    %195 = memref.load %arg4[%c57] : memref<98xf32, #tpu.memory_space<smem>>
    %196 = vector.extract_strided_slice %48 {offsets = [0, 17], sizes = [1, 256], strides = [1, 1]} : vector<1x358xf32> to vector<1x256xf32>
    %197 = vector.broadcast %195 : f32 to vector<1x256xf32>
    %198 = arith.mulf %197, %196 : vector<1x256xf32>
    %199 = arith.addf %194, %198 : vector<1x256xf32>
    %c64 = arith.constant 64 : index
    %200 = memref.load %arg4[%c64] : memref<98xf32, #tpu.memory_space<smem>>
    %201 = vector.extract_strided_slice %48 {offsets = [0, 33], sizes = [1, 256], strides = [1, 1]} : vector<1x358xf32> to vector<1x256xf32>
    %202 = vector.broadcast %200 : f32 to vector<1x256xf32>
    %203 = arith.mulf %202, %201 : vector<1x256xf32>
    %204 = arith.addf %199, %203 : vector<1x256xf32>
    %c71 = arith.constant 71 : index
    %205 = memref.load %arg4[%c71] : memref<98xf32, #tpu.memory_space<smem>>
    %206 = vector.extract_strided_slice %48 {offsets = [0, 49], sizes = [1, 256], strides = [1, 1]} : vector<1x358xf32> to vector<1x256xf32>
    %207 = vector.broadcast %205 : f32 to vector<1x256xf32>
    %208 = arith.mulf %207, %206 : vector<1x256xf32>
    %209 = arith.addf %204, %208 : vector<1x256xf32>
    %c78 = arith.constant 78 : index
    %210 = memref.load %arg4[%c78] : memref<98xf32, #tpu.memory_space<smem>>
    %211 = vector.extract_strided_slice %48 {offsets = [0, 65], sizes = [1, 256], strides = [1, 1]} : vector<1x358xf32> to vector<1x256xf32>
    %212 = vector.broadcast %210 : f32 to vector<1x256xf32>
    %213 = arith.mulf %212, %211 : vector<1x256xf32>
    %214 = arith.addf %209, %213 : vector<1x256xf32>
    %c85 = arith.constant 85 : index
    %215 = memref.load %arg4[%c85] : memref<98xf32, #tpu.memory_space<smem>>
    %216 = vector.extract_strided_slice %48 {offsets = [0, 81], sizes = [1, 256], strides = [1, 1]} : vector<1x358xf32> to vector<1x256xf32>
    %217 = vector.broadcast %215 : f32 to vector<1x256xf32>
    %218 = arith.mulf %217, %216 : vector<1x256xf32>
    %219 = arith.addf %214, %218 : vector<1x256xf32>
    %c92 = arith.constant 92 : index
    %220 = memref.load %arg4[%c92] : memref<98xf32, #tpu.memory_space<smem>>
    %221 = vector.extract_strided_slice %48 {offsets = [0, 97], sizes = [1, 256], strides = [1, 1]} : vector<1x358xf32> to vector<1x256xf32>
    %222 = vector.broadcast %220 : f32 to vector<1x256xf32>
    %223 = arith.mulf %222, %221 : vector<1x256xf32>
    %224 = arith.addf %219, %223 : vector<1x256xf32>
    %225 = arith.mulf %153, %224 : vector<1x256xf32>
    %226 = arith.addf %146, %225 : vector<1x256xf32>
    %c1_i32_33 = arith.constant 1 : i32
    %227 = vector.broadcast %c1_i32_33 : i32 to vector<1x256xi32>
    %228 = arith.cmpi sge, %65, %227 : vector<1x256xi32>
    %c16_i32_34 = arith.constant 16 : i32
    %229 = vector.broadcast %c16_i32_34 : i32 to vector<1x256xi32>
    %230 = arith.cmpi sle, %65, %229 : vector<1x256xi32>
    %231 = arith.andi %228, %230 : vector<1x256xi1>
    %232 = arith.extui %231 : vector<1x256xi1> to vector<1x256xi32>
    %233 = arith.sitofp %232 : vector<1x256xi32> to vector<1x256xf32>
    %cst_35 = arith.constant 0.000000e+00 : f32
    %234 = vector.broadcast %cst_35 : f32 to vector<1x256xf32>
    %c2 = arith.constant 2 : index
    %235 = memref.load %arg4[%c2] : memref<98xf32, #tpu.memory_space<smem>>
    %236 = vector.extract_strided_slice %47 {offsets = [0, 2], sizes = [1, 256], strides = [1, 1]} : vector<1x358xf32> to vector<1x256xf32>
    %237 = vector.broadcast %235 : f32 to vector<1x256xf32>
    %238 = arith.mulf %237, %236 : vector<1x256xf32>
    %239 = arith.addf %234, %238 : vector<1x256xf32>
    %c9 = arith.constant 9 : index
    %240 = memref.load %arg4[%c9] : memref<98xf32, #tpu.memory_space<smem>>
    %241 = vector.extract_strided_slice %47 {offsets = [0, 18], sizes = [1, 256], strides = [1, 1]} : vector<1x358xf32> to vector<1x256xf32>
    %242 = vector.broadcast %240 : f32 to vector<1x256xf32>
    %243 = arith.mulf %242, %241 : vector<1x256xf32>
    %244 = arith.addf %239, %243 : vector<1x256xf32>
    %c16 = arith.constant 16 : index
    %245 = memref.load %arg4[%c16] : memref<98xf32, #tpu.memory_space<smem>>
    %246 = vector.extract_strided_slice %47 {offsets = [0, 34], sizes = [1, 256], strides = [1, 1]} : vector<1x358xf32> to vector<1x256xf32>
    %247 = vector.broadcast %245 : f32 to vector<1x256xf32>
    %248 = arith.mulf %247, %246 : vector<1x256xf32>
    %249 = arith.addf %244, %248 : vector<1x256xf32>
    %c23 = arith.constant 23 : index
    %250 = memref.load %arg4[%c23] : memref<98xf32, #tpu.memory_space<smem>>
    %251 = vector.extract_strided_slice %47 {offsets = [0, 50], sizes = [1, 256], strides = [1, 1]} : vector<1x358xf32> to vector<1x256xf32>
    %252 = vector.broadcast %250 : f32 to vector<1x256xf32>
    %253 = arith.mulf %252, %251 : vector<1x256xf32>
    %254 = arith.addf %249, %253 : vector<1x256xf32>
    %c30 = arith.constant 30 : index
    %255 = memref.load %arg4[%c30] : memref<98xf32, #tpu.memory_space<smem>>
    %256 = vector.extract_strided_slice %47 {offsets = [0, 66], sizes = [1, 256], strides = [1, 1]} : vector<1x358xf32> to vector<1x256xf32>
    %257 = vector.broadcast %255 : f32 to vector<1x256xf32>
    %258 = arith.mulf %257, %256 : vector<1x256xf32>
    %259 = arith.addf %254, %258 : vector<1x256xf32>
    %c37 = arith.constant 37 : index
    %260 = memref.load %arg4[%c37] : memref<98xf32, #tpu.memory_space<smem>>
    %261 = vector.extract_strided_slice %47 {offsets = [0, 82], sizes = [1, 256], strides = [1, 1]} : vector<1x358xf32> to vector<1x256xf32>
    %262 = vector.broadcast %260 : f32 to vector<1x256xf32>
    %263 = arith.mulf %262, %261 : vector<1x256xf32>
    %264 = arith.addf %259, %263 : vector<1x256xf32>
    %c44 = arith.constant 44 : index
    %265 = memref.load %arg4[%c44] : memref<98xf32, #tpu.memory_space<smem>>
    %266 = vector.extract_strided_slice %47 {offsets = [0, 98], sizes = [1, 256], strides = [1, 1]} : vector<1x358xf32> to vector<1x256xf32>
    %267 = vector.broadcast %265 : f32 to vector<1x256xf32>
    %268 = arith.mulf %267, %266 : vector<1x256xf32>
    %269 = arith.addf %264, %268 : vector<1x256xf32>
    %c51_36 = arith.constant 51 : index
    %270 = memref.load %arg4[%c51_36] : memref<98xf32, #tpu.memory_space<smem>>
    %271 = vector.extract_strided_slice %48 {offsets = [0, 2], sizes = [1, 256], strides = [1, 1]} : vector<1x358xf32> to vector<1x256xf32>
    %272 = vector.broadcast %270 : f32 to vector<1x256xf32>
    %273 = arith.mulf %272, %271 : vector<1x256xf32>
    %274 = arith.addf %269, %273 : vector<1x256xf32>
    %c58 = arith.constant 58 : index
    %275 = memref.load %arg4[%c58] : memref<98xf32, #tpu.memory_space<smem>>
    %276 = vector.extract_strided_slice %48 {offsets = [0, 18], sizes = [1, 256], strides = [1, 1]} : vector<1x358xf32> to vector<1x256xf32>
    %277 = vector.broadcast %275 : f32 to vector<1x256xf32>
    %278 = arith.mulf %277, %276 : vector<1x256xf32>
    %279 = arith.addf %274, %278 : vector<1x256xf32>
    %c65 = arith.constant 65 : index
    %280 = memref.load %arg4[%c65] : memref<98xf32, #tpu.memory_space<smem>>
    %281 = vector.extract_strided_slice %48 {offsets = [0, 34], sizes = [1, 256], strides = [1, 1]} : vector<1x358xf32> to vector<1x256xf32>
    %282 = vector.broadcast %280 : f32 to vector<1x256xf32>
    %283 = arith.mulf %282, %281 : vector<1x256xf32>
    %284 = arith.addf %279, %283 : vector<1x256xf32>
    %c72 = arith.constant 72 : index
    %285 = memref.load %arg4[%c72] : memref<98xf32, #tpu.memory_space<smem>>
    %286 = vector.extract_strided_slice %48 {offsets = [0, 50], sizes = [1, 256], strides = [1, 1]} : vector<1x358xf32> to vector<1x256xf32>
    %287 = vector.broadcast %285 : f32 to vector<1x256xf32>
    %288 = arith.mulf %287, %286 : vector<1x256xf32>
    %289 = arith.addf %284, %288 : vector<1x256xf32>
    %c79 = arith.constant 79 : index
    %290 = memref.load %arg4[%c79] : memref<98xf32, #tpu.memory_space<smem>>
    %291 = vector.extract_strided_slice %48 {offsets = [0, 66], sizes = [1, 256], strides = [1, 1]} : vector<1x358xf32> to vector<1x256xf32>
    %292 = vector.broadcast %290 : f32 to vector<1x256xf32>
    %293 = arith.mulf %292, %291 : vector<1x256xf32>
    %294 = arith.addf %289, %293 : vector<1x256xf32>
    %c86 = arith.constant 86 : index
    %295 = memref.load %arg4[%c86] : memref<98xf32, #tpu.memory_space<smem>>
    %296 = vector.extract_strided_slice %48 {offsets = [0, 82], sizes = [1, 256], strides = [1, 1]} : vector<1x358xf32> to vector<1x256xf32>
    %297 = vector.broadcast %295 : f32 to vector<1x256xf32>
    %298 = arith.mulf %297, %296 : vector<1x256xf32>
    %299 = arith.addf %294, %298 : vector<1x256xf32>
    %c93 = arith.constant 93 : index
    %300 = memref.load %arg4[%c93] : memref<98xf32, #tpu.memory_space<smem>>
    %301 = vector.extract_strided_slice %48 {offsets = [0, 98], sizes = [1, 256], strides = [1, 1]} : vector<1x358xf32> to vector<1x256xf32>
    %302 = vector.broadcast %300 : f32 to vector<1x256xf32>
    %303 = arith.mulf %302, %301 : vector<1x256xf32>
    %304 = arith.addf %299, %303 : vector<1x256xf32>
    %305 = arith.mulf %233, %304 : vector<1x256xf32>
    %306 = arith.addf %226, %305 : vector<1x256xf32>
    %c0_i32_37 = arith.constant 0 : i32
    %307 = vector.broadcast %c0_i32_37 : i32 to vector<1x256xi32>
    %308 = arith.cmpi sge, %65, %307 : vector<1x256xi32>
    %c15_i32 = arith.constant 15 : i32
    %309 = vector.broadcast %c15_i32 : i32 to vector<1x256xi32>
    %310 = arith.cmpi sle, %65, %309 : vector<1x256xi32>
    %311 = arith.andi %308, %310 : vector<1x256xi1>
    %312 = arith.extui %311 : vector<1x256xi1> to vector<1x256xi32>
    %313 = arith.sitofp %312 : vector<1x256xi32> to vector<1x256xf32>
    %cst_38 = arith.constant 0.000000e+00 : f32
    %314 = vector.broadcast %cst_38 : f32 to vector<1x256xf32>
    %c3 = arith.constant 3 : index
    %315 = memref.load %arg4[%c3] : memref<98xf32, #tpu.memory_space<smem>>
    %316 = vector.extract_strided_slice %47 {offsets = [0, 3], sizes = [1, 256], strides = [1, 1]} : vector<1x358xf32> to vector<1x256xf32>
    %317 = vector.broadcast %315 : f32 to vector<1x256xf32>
    %318 = arith.mulf %317, %316 : vector<1x256xf32>
    %319 = arith.addf %314, %318 : vector<1x256xf32>
    %c10 = arith.constant 10 : index
    %320 = memref.load %arg4[%c10] : memref<98xf32, #tpu.memory_space<smem>>
    %321 = vector.extract_strided_slice %47 {offsets = [0, 19], sizes = [1, 256], strides = [1, 1]} : vector<1x358xf32> to vector<1x256xf32>
    %322 = vector.broadcast %320 : f32 to vector<1x256xf32>
    %323 = arith.mulf %322, %321 : vector<1x256xf32>
    %324 = arith.addf %319, %323 : vector<1x256xf32>
    %c17 = arith.constant 17 : index
    %325 = memref.load %arg4[%c17] : memref<98xf32, #tpu.memory_space<smem>>
    %326 = vector.extract_strided_slice %47 {offsets = [0, 35], sizes = [1, 256], strides = [1, 1]} : vector<1x358xf32> to vector<1x256xf32>
    %327 = vector.broadcast %325 : f32 to vector<1x256xf32>
    %328 = arith.mulf %327, %326 : vector<1x256xf32>
    %329 = arith.addf %324, %328 : vector<1x256xf32>
    %c24 = arith.constant 24 : index
    %330 = memref.load %arg4[%c24] : memref<98xf32, #tpu.memory_space<smem>>
    %331 = vector.extract_strided_slice %47 {offsets = [0, 51], sizes = [1, 256], strides = [1, 1]} : vector<1x358xf32> to vector<1x256xf32>
    %332 = vector.broadcast %330 : f32 to vector<1x256xf32>
    %333 = arith.mulf %332, %331 : vector<1x256xf32>
    %334 = arith.addf %329, %333 : vector<1x256xf32>
    %c31 = arith.constant 31 : index
    %335 = memref.load %arg4[%c31] : memref<98xf32, #tpu.memory_space<smem>>
    %336 = vector.extract_strided_slice %47 {offsets = [0, 67], sizes = [1, 256], strides = [1, 1]} : vector<1x358xf32> to vector<1x256xf32>
    %337 = vector.broadcast %335 : f32 to vector<1x256xf32>
    %338 = arith.mulf %337, %336 : vector<1x256xf32>
    %339 = arith.addf %334, %338 : vector<1x256xf32>
    %c38 = arith.constant 38 : index
    %340 = memref.load %arg4[%c38] : memref<98xf32, #tpu.memory_space<smem>>
    %341 = vector.extract_strided_slice %47 {offsets = [0, 83], sizes = [1, 256], strides = [1, 1]} : vector<1x358xf32> to vector<1x256xf32>
    %342 = vector.broadcast %340 : f32 to vector<1x256xf32>
    %343 = arith.mulf %342, %341 : vector<1x256xf32>
    %344 = arith.addf %339, %343 : vector<1x256xf32>
    %c45 = arith.constant 45 : index
    %345 = memref.load %arg4[%c45] : memref<98xf32, #tpu.memory_space<smem>>
    %346 = vector.extract_strided_slice %47 {offsets = [0, 99], sizes = [1, 256], strides = [1, 1]} : vector<1x358xf32> to vector<1x256xf32>
    %347 = vector.broadcast %345 : f32 to vector<1x256xf32>
    %348 = arith.mulf %347, %346 : vector<1x256xf32>
    %349 = arith.addf %344, %348 : vector<1x256xf32>
    %c52 = arith.constant 52 : index
    %350 = memref.load %arg4[%c52] : memref<98xf32, #tpu.memory_space<smem>>
    %351 = vector.extract_strided_slice %48 {offsets = [0, 3], sizes = [1, 256], strides = [1, 1]} : vector<1x358xf32> to vector<1x256xf32>
    %352 = vector.broadcast %350 : f32 to vector<1x256xf32>
    %353 = arith.mulf %352, %351 : vector<1x256xf32>
    %354 = arith.addf %349, %353 : vector<1x256xf32>
    %c59 = arith.constant 59 : index
    %355 = memref.load %arg4[%c59] : memref<98xf32, #tpu.memory_space<smem>>
    %356 = vector.extract_strided_slice %48 {offsets = [0, 19], sizes = [1, 256], strides = [1, 1]} : vector<1x358xf32> to vector<1x256xf32>
    %357 = vector.broadcast %355 : f32 to vector<1x256xf32>
    %358 = arith.mulf %357, %356 : vector<1x256xf32>
    %359 = arith.addf %354, %358 : vector<1x256xf32>
    %c66 = arith.constant 66 : index
    %360 = memref.load %arg4[%c66] : memref<98xf32, #tpu.memory_space<smem>>
    %361 = vector.extract_strided_slice %48 {offsets = [0, 35], sizes = [1, 256], strides = [1, 1]} : vector<1x358xf32> to vector<1x256xf32>
    %362 = vector.broadcast %360 : f32 to vector<1x256xf32>
    %363 = arith.mulf %362, %361 : vector<1x256xf32>
    %364 = arith.addf %359, %363 : vector<1x256xf32>
    %c73 = arith.constant 73 : index
    %365 = memref.load %arg4[%c73] : memref<98xf32, #tpu.memory_space<smem>>
    %366 = vector.extract_strided_slice %48 {offsets = [0, 51], sizes = [1, 256], strides = [1, 1]} : vector<1x358xf32> to vector<1x256xf32>
    %367 = vector.broadcast %365 : f32 to vector<1x256xf32>
    %368 = arith.mulf %367, %366 : vector<1x256xf32>
    %369 = arith.addf %364, %368 : vector<1x256xf32>
    %c80 = arith.constant 80 : index
    %370 = memref.load %arg4[%c80] : memref<98xf32, #tpu.memory_space<smem>>
    %371 = vector.extract_strided_slice %48 {offsets = [0, 67], sizes = [1, 256], strides = [1, 1]} : vector<1x358xf32> to vector<1x256xf32>
    %372 = vector.broadcast %370 : f32 to vector<1x256xf32>
    %373 = arith.mulf %372, %371 : vector<1x256xf32>
    %374 = arith.addf %369, %373 : vector<1x256xf32>
    %c87 = arith.constant 87 : index
    %375 = memref.load %arg4[%c87] : memref<98xf32, #tpu.memory_space<smem>>
    %376 = vector.extract_strided_slice %48 {offsets = [0, 83], sizes = [1, 256], strides = [1, 1]} : vector<1x358xf32> to vector<1x256xf32>
    %377 = vector.broadcast %375 : f32 to vector<1x256xf32>
    %378 = arith.mulf %377, %376 : vector<1x256xf32>
    %379 = arith.addf %374, %378 : vector<1x256xf32>
    %c94 = arith.constant 94 : index
    %380 = memref.load %arg4[%c94] : memref<98xf32, #tpu.memory_space<smem>>
    %381 = vector.extract_strided_slice %48 {offsets = [0, 99], sizes = [1, 256], strides = [1, 1]} : vector<1x358xf32> to vector<1x256xf32>
    %382 = vector.broadcast %380 : f32 to vector<1x256xf32>
    %383 = arith.mulf %382, %381 : vector<1x256xf32>
    %384 = arith.addf %379, %383 : vector<1x256xf32>
    %385 = arith.mulf %313, %384 : vector<1x256xf32>
    %386 = arith.addf %306, %385 : vector<1x256xf32>
    %c-1_i32 = arith.constant -1 : i32
    %387 = vector.broadcast %c-1_i32 : i32 to vector<1x256xi32>
    %388 = arith.cmpi sge, %65, %387 : vector<1x256xi32>
    %c14_i32 = arith.constant 14 : i32
    %389 = vector.broadcast %c14_i32 : i32 to vector<1x256xi32>
    %390 = arith.cmpi sle, %65, %389 : vector<1x256xi32>
    %391 = arith.andi %388, %390 : vector<1x256xi1>
    %392 = arith.extui %391 : vector<1x256xi1> to vector<1x256xi32>
    %393 = arith.sitofp %392 : vector<1x256xi32> to vector<1x256xf32>
    %cst_39 = arith.constant 0.000000e+00 : f32
    %394 = vector.broadcast %cst_39 : f32 to vector<1x256xf32>
    %c4 = arith.constant 4 : index
    %395 = memref.load %arg4[%c4] : memref<98xf32, #tpu.memory_space<smem>>
    %396 = vector.extract_strided_slice %47 {offsets = [0, 4], sizes = [1, 256], strides = [1, 1]} : vector<1x358xf32> to vector<1x256xf32>
    %397 = vector.broadcast %395 : f32 to vector<1x256xf32>
    %398 = arith.mulf %397, %396 : vector<1x256xf32>
    %399 = arith.addf %394, %398 : vector<1x256xf32>
    %c11 = arith.constant 11 : index
    %400 = memref.load %arg4[%c11] : memref<98xf32, #tpu.memory_space<smem>>
    %401 = vector.extract_strided_slice %47 {offsets = [0, 20], sizes = [1, 256], strides = [1, 1]} : vector<1x358xf32> to vector<1x256xf32>
    %402 = vector.broadcast %400 : f32 to vector<1x256xf32>
    %403 = arith.mulf %402, %401 : vector<1x256xf32>
    %404 = arith.addf %399, %403 : vector<1x256xf32>
    %c18 = arith.constant 18 : index
    %405 = memref.load %arg4[%c18] : memref<98xf32, #tpu.memory_space<smem>>
    %406 = vector.extract_strided_slice %47 {offsets = [0, 36], sizes = [1, 256], strides = [1, 1]} : vector<1x358xf32> to vector<1x256xf32>
    %407 = vector.broadcast %405 : f32 to vector<1x256xf32>
    %408 = arith.mulf %407, %406 : vector<1x256xf32>
    %409 = arith.addf %404, %408 : vector<1x256xf32>
    %c25 = arith.constant 25 : index
    %410 = memref.load %arg4[%c25] : memref<98xf32, #tpu.memory_space<smem>>
    %411 = vector.extract_strided_slice %47 {offsets = [0, 52], sizes = [1, 256], strides = [1, 1]} : vector<1x358xf32> to vector<1x256xf32>
    %412 = vector.broadcast %410 : f32 to vector<1x256xf32>
    %413 = arith.mulf %412, %411 : vector<1x256xf32>
    %414 = arith.addf %409, %413 : vector<1x256xf32>
    %c32 = arith.constant 32 : index
    %415 = memref.load %arg4[%c32] : memref<98xf32, #tpu.memory_space<smem>>
    %416 = vector.extract_strided_slice %47 {offsets = [0, 68], sizes = [1, 256], strides = [1, 1]} : vector<1x358xf32> to vector<1x256xf32>
    %417 = vector.broadcast %415 : f32 to vector<1x256xf32>
    %418 = arith.mulf %417, %416 : vector<1x256xf32>
    %419 = arith.addf %414, %418 : vector<1x256xf32>
    %c39 = arith.constant 39 : index
    %420 = memref.load %arg4[%c39] : memref<98xf32, #tpu.memory_space<smem>>
    %421 = vector.extract_strided_slice %47 {offsets = [0, 84], sizes = [1, 256], strides = [1, 1]} : vector<1x358xf32> to vector<1x256xf32>
    %422 = vector.broadcast %420 : f32 to vector<1x256xf32>
    %423 = arith.mulf %422, %421 : vector<1x256xf32>
    %424 = arith.addf %419, %423 : vector<1x256xf32>
    %c46 = arith.constant 46 : index
    %425 = memref.load %arg4[%c46] : memref<98xf32, #tpu.memory_space<smem>>
    %426 = vector.extract_strided_slice %47 {offsets = [0, 100], sizes = [1, 256], strides = [1, 1]} : vector<1x358xf32> to vector<1x256xf32>
    %427 = vector.broadcast %425 : f32 to vector<1x256xf32>
    %428 = arith.mulf %427, %426 : vector<1x256xf32>
    %429 = arith.addf %424, %428 : vector<1x256xf32>
    %c53 = arith.constant 53 : index
    %430 = memref.load %arg4[%c53] : memref<98xf32, #tpu.memory_space<smem>>
    %431 = vector.extract_strided_slice %48 {offsets = [0, 4], sizes = [1, 256], strides = [1, 1]} : vector<1x358xf32> to vector<1x256xf32>
    %432 = vector.broadcast %430 : f32 to vector<1x256xf32>
    %433 = arith.mulf %432, %431 : vector<1x256xf32>
    %434 = arith.addf %429, %433 : vector<1x256xf32>
    %c60 = arith.constant 60 : index
    %435 = memref.load %arg4[%c60] : memref<98xf32, #tpu.memory_space<smem>>
    %436 = vector.extract_strided_slice %48 {offsets = [0, 20], sizes = [1, 256], strides = [1, 1]} : vector<1x358xf32> to vector<1x256xf32>
    %437 = vector.broadcast %435 : f32 to vector<1x256xf32>
    %438 = arith.mulf %437, %436 : vector<1x256xf32>
    %439 = arith.addf %434, %438 : vector<1x256xf32>
    %c67 = arith.constant 67 : index
    %440 = memref.load %arg4[%c67] : memref<98xf32, #tpu.memory_space<smem>>
    %441 = vector.extract_strided_slice %48 {offsets = [0, 36], sizes = [1, 256], strides = [1, 1]} : vector<1x358xf32> to vector<1x256xf32>
    %442 = vector.broadcast %440 : f32 to vector<1x256xf32>
    %443 = arith.mulf %442, %441 : vector<1x256xf32>
    %444 = arith.addf %439, %443 : vector<1x256xf32>
    %c74 = arith.constant 74 : index
    %445 = memref.load %arg4[%c74] : memref<98xf32, #tpu.memory_space<smem>>
    %446 = vector.extract_strided_slice %48 {offsets = [0, 52], sizes = [1, 256], strides = [1, 1]} : vector<1x358xf32> to vector<1x256xf32>
    %447 = vector.broadcast %445 : f32 to vector<1x256xf32>
    %448 = arith.mulf %447, %446 : vector<1x256xf32>
    %449 = arith.addf %444, %448 : vector<1x256xf32>
    %c81 = arith.constant 81 : index
    %450 = memref.load %arg4[%c81] : memref<98xf32, #tpu.memory_space<smem>>
    %451 = vector.extract_strided_slice %48 {offsets = [0, 68], sizes = [1, 256], strides = [1, 1]} : vector<1x358xf32> to vector<1x256xf32>
    %452 = vector.broadcast %450 : f32 to vector<1x256xf32>
    %453 = arith.mulf %452, %451 : vector<1x256xf32>
    %454 = arith.addf %449, %453 : vector<1x256xf32>
    %c88 = arith.constant 88 : index
    %455 = memref.load %arg4[%c88] : memref<98xf32, #tpu.memory_space<smem>>
    %456 = vector.extract_strided_slice %48 {offsets = [0, 84], sizes = [1, 256], strides = [1, 1]} : vector<1x358xf32> to vector<1x256xf32>
    %457 = vector.broadcast %455 : f32 to vector<1x256xf32>
    %458 = arith.mulf %457, %456 : vector<1x256xf32>
    %459 = arith.addf %454, %458 : vector<1x256xf32>
    %c95 = arith.constant 95 : index
    %460 = memref.load %arg4[%c95] : memref<98xf32, #tpu.memory_space<smem>>
    %461 = vector.extract_strided_slice %48 {offsets = [0, 100], sizes = [1, 256], strides = [1, 1]} : vector<1x358xf32> to vector<1x256xf32>
    %462 = vector.broadcast %460 : f32 to vector<1x256xf32>
    %463 = arith.mulf %462, %461 : vector<1x256xf32>
    %464 = arith.addf %459, %463 : vector<1x256xf32>
    %465 = arith.mulf %393, %464 : vector<1x256xf32>
    %466 = arith.addf %386, %465 : vector<1x256xf32>
    %c-2_i32 = arith.constant -2 : i32
    %467 = vector.broadcast %c-2_i32 : i32 to vector<1x256xi32>
    %468 = arith.cmpi sge, %65, %467 : vector<1x256xi32>
    %c13_i32 = arith.constant 13 : i32
    %469 = vector.broadcast %c13_i32 : i32 to vector<1x256xi32>
    %470 = arith.cmpi sle, %65, %469 : vector<1x256xi32>
    %471 = arith.andi %468, %470 : vector<1x256xi1>
    %472 = arith.extui %471 : vector<1x256xi1> to vector<1x256xi32>
    %473 = arith.sitofp %472 : vector<1x256xi32> to vector<1x256xf32>
    %cst_40 = arith.constant 0.000000e+00 : f32
    %474 = vector.broadcast %cst_40 : f32 to vector<1x256xf32>
    %c5 = arith.constant 5 : index
    %475 = memref.load %arg4[%c5] : memref<98xf32, #tpu.memory_space<smem>>
    %476 = vector.extract_strided_slice %47 {offsets = [0, 5], sizes = [1, 256], strides = [1, 1]} : vector<1x358xf32> to vector<1x256xf32>
    %477 = vector.broadcast %475 : f32 to vector<1x256xf32>
    %478 = arith.mulf %477, %476 : vector<1x256xf32>
    %479 = arith.addf %474, %478 : vector<1x256xf32>
    %c12 = arith.constant 12 : index
    %480 = memref.load %arg4[%c12] : memref<98xf32, #tpu.memory_space<smem>>
    %481 = vector.extract_strided_slice %47 {offsets = [0, 21], sizes = [1, 256], strides = [1, 1]} : vector<1x358xf32> to vector<1x256xf32>
    %482 = vector.broadcast %480 : f32 to vector<1x256xf32>
    %483 = arith.mulf %482, %481 : vector<1x256xf32>
    %484 = arith.addf %479, %483 : vector<1x256xf32>
    %c19 = arith.constant 19 : index
    %485 = memref.load %arg4[%c19] : memref<98xf32, #tpu.memory_space<smem>>
    %486 = vector.extract_strided_slice %47 {offsets = [0, 37], sizes = [1, 256], strides = [1, 1]} : vector<1x358xf32> to vector<1x256xf32>
    %487 = vector.broadcast %485 : f32 to vector<1x256xf32>
    %488 = arith.mulf %487, %486 : vector<1x256xf32>
    %489 = arith.addf %484, %488 : vector<1x256xf32>
    %c26 = arith.constant 26 : index
    %490 = memref.load %arg4[%c26] : memref<98xf32, #tpu.memory_space<smem>>
    %491 = vector.extract_strided_slice %47 {offsets = [0, 53], sizes = [1, 256], strides = [1, 1]} : vector<1x358xf32> to vector<1x256xf32>
    %492 = vector.broadcast %490 : f32 to vector<1x256xf32>
    %493 = arith.mulf %492, %491 : vector<1x256xf32>
    %494 = arith.addf %489, %493 : vector<1x256xf32>
    %c33 = arith.constant 33 : index
    %495 = memref.load %arg4[%c33] : memref<98xf32, #tpu.memory_space<smem>>
    %496 = vector.extract_strided_slice %47 {offsets = [0, 69], sizes = [1, 256], strides = [1, 1]} : vector<1x358xf32> to vector<1x256xf32>
    %497 = vector.broadcast %495 : f32 to vector<1x256xf32>
    %498 = arith.mulf %497, %496 : vector<1x256xf32>
    %499 = arith.addf %494, %498 : vector<1x256xf32>
    %c40 = arith.constant 40 : index
    %500 = memref.load %arg4[%c40] : memref<98xf32, #tpu.memory_space<smem>>
    %501 = vector.extract_strided_slice %47 {offsets = [0, 85], sizes = [1, 256], strides = [1, 1]} : vector<1x358xf32> to vector<1x256xf32>
    %502 = vector.broadcast %500 : f32 to vector<1x256xf32>
    %503 = arith.mulf %502, %501 : vector<1x256xf32>
    %504 = arith.addf %499, %503 : vector<1x256xf32>
    %c47 = arith.constant 47 : index
    %505 = memref.load %arg4[%c47] : memref<98xf32, #tpu.memory_space<smem>>
    %506 = vector.extract_strided_slice %47 {offsets = [0, 101], sizes = [1, 256], strides = [1, 1]} : vector<1x358xf32> to vector<1x256xf32>
    %507 = vector.broadcast %505 : f32 to vector<1x256xf32>
    %508 = arith.mulf %507, %506 : vector<1x256xf32>
    %509 = arith.addf %504, %508 : vector<1x256xf32>
    %c54 = arith.constant 54 : index
    %510 = memref.load %arg4[%c54] : memref<98xf32, #tpu.memory_space<smem>>
    %511 = vector.extract_strided_slice %48 {offsets = [0, 5], sizes = [1, 256], strides = [1, 1]} : vector<1x358xf32> to vector<1x256xf32>
    %512 = vector.broadcast %510 : f32 to vector<1x256xf32>
    %513 = arith.mulf %512, %511 : vector<1x256xf32>
    %514 = arith.addf %509, %513 : vector<1x256xf32>
    %c61 = arith.constant 61 : index
    %515 = memref.load %arg4[%c61] : memref<98xf32, #tpu.memory_space<smem>>
    %516 = vector.extract_strided_slice %48 {offsets = [0, 21], sizes = [1, 256], strides = [1, 1]} : vector<1x358xf32> to vector<1x256xf32>
    %517 = vector.broadcast %515 : f32 to vector<1x256xf32>
    %518 = arith.mulf %517, %516 : vector<1x256xf32>
    %519 = arith.addf %514, %518 : vector<1x256xf32>
    %c68 = arith.constant 68 : index
    %520 = memref.load %arg4[%c68] : memref<98xf32, #tpu.memory_space<smem>>
    %521 = vector.extract_strided_slice %48 {offsets = [0, 37], sizes = [1, 256], strides = [1, 1]} : vector<1x358xf32> to vector<1x256xf32>
    %522 = vector.broadcast %520 : f32 to vector<1x256xf32>
    %523 = arith.mulf %522, %521 : vector<1x256xf32>
    %524 = arith.addf %519, %523 : vector<1x256xf32>
    %c75 = arith.constant 75 : index
    %525 = memref.load %arg4[%c75] : memref<98xf32, #tpu.memory_space<smem>>
    %526 = vector.extract_strided_slice %48 {offsets = [0, 53], sizes = [1, 256], strides = [1, 1]} : vector<1x358xf32> to vector<1x256xf32>
    %527 = vector.broadcast %525 : f32 to vector<1x256xf32>
    %528 = arith.mulf %527, %526 : vector<1x256xf32>
    %529 = arith.addf %524, %528 : vector<1x256xf32>
    %c82 = arith.constant 82 : index
    %530 = memref.load %arg4[%c82] : memref<98xf32, #tpu.memory_space<smem>>
    %531 = vector.extract_strided_slice %48 {offsets = [0, 69], sizes = [1, 256], strides = [1, 1]} : vector<1x358xf32> to vector<1x256xf32>
    %532 = vector.broadcast %530 : f32 to vector<1x256xf32>
    %533 = arith.mulf %532, %531 : vector<1x256xf32>
    %534 = arith.addf %529, %533 : vector<1x256xf32>
    %c89 = arith.constant 89 : index
    %535 = memref.load %arg4[%c89] : memref<98xf32, #tpu.memory_space<smem>>
    %536 = vector.extract_strided_slice %48 {offsets = [0, 85], sizes = [1, 256], strides = [1, 1]} : vector<1x358xf32> to vector<1x256xf32>
    %537 = vector.broadcast %535 : f32 to vector<1x256xf32>
    %538 = arith.mulf %537, %536 : vector<1x256xf32>
    %539 = arith.addf %534, %538 : vector<1x256xf32>
    %c96 = arith.constant 96 : index
    %540 = memref.load %arg4[%c96] : memref<98xf32, #tpu.memory_space<smem>>
    %541 = vector.extract_strided_slice %48 {offsets = [0, 101], sizes = [1, 256], strides = [1, 1]} : vector<1x358xf32> to vector<1x256xf32>
    %542 = vector.broadcast %540 : f32 to vector<1x256xf32>
    %543 = arith.mulf %542, %541 : vector<1x256xf32>
    %544 = arith.addf %539, %543 : vector<1x256xf32>
    %545 = arith.mulf %473, %544 : vector<1x256xf32>
    %546 = arith.addf %466, %545 : vector<1x256xf32>
    %c-3_i32 = arith.constant -3 : i32
    %547 = vector.broadcast %c-3_i32 : i32 to vector<1x256xi32>
    %548 = arith.cmpi sge, %65, %547 : vector<1x256xi32>
    %c12_i32 = arith.constant 12 : i32
    %549 = vector.broadcast %c12_i32 : i32 to vector<1x256xi32>
    %550 = arith.cmpi sle, %65, %549 : vector<1x256xi32>
    %551 = arith.andi %548, %550 : vector<1x256xi1>
    %552 = arith.extui %551 : vector<1x256xi1> to vector<1x256xi32>
    %553 = arith.sitofp %552 : vector<1x256xi32> to vector<1x256xf32>
    %cst_41 = arith.constant 0.000000e+00 : f32
    %554 = vector.broadcast %cst_41 : f32 to vector<1x256xf32>
    %c6 = arith.constant 6 : index
    %555 = memref.load %arg4[%c6] : memref<98xf32, #tpu.memory_space<smem>>
    %556 = vector.extract_strided_slice %47 {offsets = [0, 6], sizes = [1, 256], strides = [1, 1]} : vector<1x358xf32> to vector<1x256xf32>
    %557 = vector.broadcast %555 : f32 to vector<1x256xf32>
    %558 = arith.mulf %557, %556 : vector<1x256xf32>
    %559 = arith.addf %554, %558 : vector<1x256xf32>
    %c13 = arith.constant 13 : index
    %560 = memref.load %arg4[%c13] : memref<98xf32, #tpu.memory_space<smem>>
    %561 = vector.extract_strided_slice %47 {offsets = [0, 22], sizes = [1, 256], strides = [1, 1]} : vector<1x358xf32> to vector<1x256xf32>
    %562 = vector.broadcast %560 : f32 to vector<1x256xf32>
    %563 = arith.mulf %562, %561 : vector<1x256xf32>
    %564 = arith.addf %559, %563 : vector<1x256xf32>
    %c20 = arith.constant 20 : index
    %565 = memref.load %arg4[%c20] : memref<98xf32, #tpu.memory_space<smem>>
    %566 = vector.extract_strided_slice %47 {offsets = [0, 38], sizes = [1, 256], strides = [1, 1]} : vector<1x358xf32> to vector<1x256xf32>
    %567 = vector.broadcast %565 : f32 to vector<1x256xf32>
    %568 = arith.mulf %567, %566 : vector<1x256xf32>
    %569 = arith.addf %564, %568 : vector<1x256xf32>
    %c27 = arith.constant 27 : index
    %570 = memref.load %arg4[%c27] : memref<98xf32, #tpu.memory_space<smem>>
    %571 = vector.extract_strided_slice %47 {offsets = [0, 54], sizes = [1, 256], strides = [1, 1]} : vector<1x358xf32> to vector<1x256xf32>
    %572 = vector.broadcast %570 : f32 to vector<1x256xf32>
    %573 = arith.mulf %572, %571 : vector<1x256xf32>
    %574 = arith.addf %569, %573 : vector<1x256xf32>
    %c34 = arith.constant 34 : index
    %575 = memref.load %arg4[%c34] : memref<98xf32, #tpu.memory_space<smem>>
    %576 = vector.extract_strided_slice %47 {offsets = [0, 70], sizes = [1, 256], strides = [1, 1]} : vector<1x358xf32> to vector<1x256xf32>
    %577 = vector.broadcast %575 : f32 to vector<1x256xf32>
    %578 = arith.mulf %577, %576 : vector<1x256xf32>
    %579 = arith.addf %574, %578 : vector<1x256xf32>
    %c41 = arith.constant 41 : index
    %580 = memref.load %arg4[%c41] : memref<98xf32, #tpu.memory_space<smem>>
    %581 = vector.extract_strided_slice %47 {offsets = [0, 86], sizes = [1, 256], strides = [1, 1]} : vector<1x358xf32> to vector<1x256xf32>
    %582 = vector.broadcast %580 : f32 to vector<1x256xf32>
    %583 = arith.mulf %582, %581 : vector<1x256xf32>
    %584 = arith.addf %579, %583 : vector<1x256xf32>
    %c48 = arith.constant 48 : index
    %585 = memref.load %arg4[%c48] : memref<98xf32, #tpu.memory_space<smem>>
    %586 = vector.extract_strided_slice %47 {offsets = [0, 102], sizes = [1, 256], strides = [1, 1]} : vector<1x358xf32> to vector<1x256xf32>
    %587 = vector.broadcast %585 : f32 to vector<1x256xf32>
    %588 = arith.mulf %587, %586 : vector<1x256xf32>
    %589 = arith.addf %584, %588 : vector<1x256xf32>
    %c55 = arith.constant 55 : index
    %590 = memref.load %arg4[%c55] : memref<98xf32, #tpu.memory_space<smem>>
    %591 = vector.extract_strided_slice %48 {offsets = [0, 6], sizes = [1, 256], strides = [1, 1]} : vector<1x358xf32> to vector<1x256xf32>
    %592 = vector.broadcast %590 : f32 to vector<1x256xf32>
    %593 = arith.mulf %592, %591 : vector<1x256xf32>
    %594 = arith.addf %589, %593 : vector<1x256xf32>
    %c62 = arith.constant 62 : index
    %595 = memref.load %arg4[%c62] : memref<98xf32, #tpu.memory_space<smem>>
    %596 = vector.extract_strided_slice %48 {offsets = [0, 22], sizes = [1, 256], strides = [1, 1]} : vector<1x358xf32> to vector<1x256xf32>
    %597 = vector.broadcast %595 : f32 to vector<1x256xf32>
    %598 = arith.mulf %597, %596 : vector<1x256xf32>
    %599 = arith.addf %594, %598 : vector<1x256xf32>
    %c69 = arith.constant 69 : index
    %600 = memref.load %arg4[%c69] : memref<98xf32, #tpu.memory_space<smem>>
    %601 = vector.extract_strided_slice %48 {offsets = [0, 38], sizes = [1, 256], strides = [1, 1]} : vector<1x358xf32> to vector<1x256xf32>
    %602 = vector.broadcast %600 : f32 to vector<1x256xf32>
    %603 = arith.mulf %602, %601 : vector<1x256xf32>
    %604 = arith.addf %599, %603 : vector<1x256xf32>
    %c76 = arith.constant 76 : index
    %605 = memref.load %arg4[%c76] : memref<98xf32, #tpu.memory_space<smem>>
    %606 = vector.extract_strided_slice %48 {offsets = [0, 54], sizes = [1, 256], strides = [1, 1]} : vector<1x358xf32> to vector<1x256xf32>
    %607 = vector.broadcast %605 : f32 to vector<1x256xf32>
    %608 = arith.mulf %607, %606 : vector<1x256xf32>
    %609 = arith.addf %604, %608 : vector<1x256xf32>
    %c83 = arith.constant 83 : index
    %610 = memref.load %arg4[%c83] : memref<98xf32, #tpu.memory_space<smem>>
    %611 = vector.extract_strided_slice %48 {offsets = [0, 70], sizes = [1, 256], strides = [1, 1]} : vector<1x358xf32> to vector<1x256xf32>
    %612 = vector.broadcast %610 : f32 to vector<1x256xf32>
    %613 = arith.mulf %612, %611 : vector<1x256xf32>
    %614 = arith.addf %609, %613 : vector<1x256xf32>
    %c90 = arith.constant 90 : index
    %615 = memref.load %arg4[%c90] : memref<98xf32, #tpu.memory_space<smem>>
    %616 = vector.extract_strided_slice %48 {offsets = [0, 86], sizes = [1, 256], strides = [1, 1]} : vector<1x358xf32> to vector<1x256xf32>
    %617 = vector.broadcast %615 : f32 to vector<1x256xf32>
    %618 = arith.mulf %617, %616 : vector<1x256xf32>
    %619 = arith.addf %614, %618 : vector<1x256xf32>
    %c97 = arith.constant 97 : index
    %620 = memref.load %arg4[%c97] : memref<98xf32, #tpu.memory_space<smem>>
    %621 = vector.extract_strided_slice %48 {offsets = [0, 102], sizes = [1, 256], strides = [1, 1]} : vector<1x358xf32> to vector<1x256xf32>
    %622 = vector.broadcast %620 : f32 to vector<1x256xf32>
    %623 = arith.mulf %622, %621 : vector<1x256xf32>
    %624 = arith.addf %619, %623 : vector<1x256xf32>
    %625 = arith.mulf %553, %624 : vector<1x256xf32>
    %626 = arith.addf %546, %625 : vector<1x256xf32>
    %627 = arith.negf %626 : vector<1x256xf32>
    %628 = math.exp %627 : vector<1x256xf32>
    %cst_42 = arith.constant 1.000000e+00 : f32
    %629 = vector.broadcast %cst_42 : f32 to vector<1x256xf32>
    %630 = arith.addf %629, %628 : vector<1x256xf32>
    %631 = arith.divf %629, %630 : vector<1x256xf32>
    %632 = vector.broadcast %631 : vector<1x256xf32> to vector<3x256xf32>
    %633 = arith.mulf %35, %632 : vector<3x256xf32>
    %c0_43 = arith.constant 0 : index
    %c0_44 = arith.constant 0 : index
    %c0_45 = arith.constant 0 : index
    %634 = vector.load %arg5[%c0_43, %c0_44, %c0_45] : memref<1x3x256xf32, #tpu.memory_space<vmem>>, vector<1x3x256xf32>
    %635 = vector.shape_cast %634 : vector<1x3x256xf32> to vector<3x256xf32>
    %636 = vector.shape_cast %633 : vector<3x256xf32> to vector<1x3x256xf32>
    tpu.vector_store %arg5[%c0_43, %c0_44, %c0_45], %636 {strides = array<i32>} : memref<1x3x256xf32, #tpu.memory_space<vmem>>, vector<1x3x256xf32>,
    return
  }
  func.func @transform_0(%arg0: i32) -> (i32, i32, i32) {
    %c0_i32 = arith.constant 0 : i32
    %c0_i32_0 = arith.constant 0 : i32
    %c0_i32_1 = arith.constant 0 : i32
    return %arg0, %c0_i32, %c0_i32_0 : i32, i32, i32
  }
  func.func @transform_1(%arg0: i32) -> (i32, i32) {
    %c0_i32 = arith.constant 0 : i32
    %c0_i32_0 = arith.constant 0 : i32
    %c0_i32_1 = arith.constant 0 : i32
    return %c0_i32, %c0_i32_0 : i32, i32
  }
  func.func @transform_2(%arg0: i32) -> (i32, i32) {
    %c0_i32 = arith.constant 0 : i32
    %c0_i32_0 = arith.constant 0 : i32
    %c0_i32_1 = arith.constant 0 : i32
    return %c0_i32, %c0_i32_0 : i32, i32
  }
  func.func @transform_3(%arg0: i32) -> i32 {
    %c0_i32 = arith.constant 0 : i32
    %c0_i32_0 = arith.constant 0 : i32
    return %c0_i32 : i32
  }
  func.func @transform_4(%arg0: i32) -> (i32, i32, i32) {
    %c0_i32 = arith.constant 0 : i32
    %c0_i32_0 = arith.constant 0 : i32
    %c0_i32_1 = arith.constant 0 : i32
    return %arg0, %c0_i32, %c0_i32_0 : i32, i32, i32
  }
}

</mosaic_0001>

<bundles_post_ra>
// kernel: tpu_custom_call.1
= control target key start
LH: loop header
LB: loop body
LE: loop exit
PB: predicated region body
PF: predicated region fallthrough
CT: control target
= control target key end

     0   :  { %9 = vsyncpa [#allocation4], 0  ;;  %s2052_s15 = smov 0   ;;  %s2678_s0 = inlined_call_operand.vmem [shape: f32[2,3,256], index: 0, kind: input, shape index: {}]   ;;  %s2679_s1 = inlined_call_operand.vmem [shape: f32[3,1], index: 1, kind: input, shape index: {}]   ;;  %s2680_s2 = inlined_call_operand.vmem [shape: f32[3,1], index: 2, kind: input, shape index: {}]   ;;  %s2681_s3 = inlined_call_operand.vmem [shape: f32[98], index: 3, kind: input, shape index: {}]   ;;  %s2682_s4 = inlined_call_operand.vmem [shape: f32[2,3,256], index: 4, kind: output, shape index: {}]  }
   0x1 LB: > { %s1754_s16 = sadd.s32 4294967295, %s2007_s15   ;;  %p1756_p0 = scmp.ge.s32.totalorder %s2007_s15, 1  ;;  %s2007_s15 = sphi %s2052_s15, %s15_s15  }
   0x2   : > { %p135_p1 = scmp.lt.s32.totalorder %s2007_s15, 3  ;;  %s154_s19 = sshll.u32 %s2681_s3, 4  ;;  %s155_s19 = int_to_ptr.vmem [resolvable:$true] %s154_s19 }
   0x3   : > { %p1938_p3 = scmp.eq.s32.totalorder %s1754_s16, 0  ;;  %s1982_s21 = scalar_lea.vmem %s155_s19, 16 }
   0x4   : > { %p2063_p2 = pnand %p1756_p0, %p135_p1  ;;  %p1983_p6 = scmp.ne.s32.totalorder %s155_s19, %s1982_s21 }
   0x5   : > { %p1990_p10 = scmp.lt.s32.totalorder %s155_s19, %s155_s19  ;;  %p1991_p11 = scmp.lt.s32.totalorder %s1982_s21, %s1982_s21 }
   0x6   : > { %p1934_p4 = pneg %p2063_p2 }
   0x7   : > { %p1992_p12 = por %p1991_p11, %p1990_p10 }
   0x8   : > { %p1935_p5 = pnand %p1938_p3, %p1934_p4 }
   0xa   : > { %p1984_p7 = pneg %p1935_p5 }
   0xc   : > { %p1985_p8 = pnand %p1984_p7, %p1983_p6 }
   0xe   : > { %p1986_p9 = pneg %p1985_p8 }
  0x10   : > { %p1993_p13 = pnand %p1992_p12, %p1986_p9 }
  0x12   : > { %1996 = shalt.err (!%p1993_p13)
}
  0x13   : > { %s2009_s22 = smov [#allocation3]   ;;  %175 = sbr.rel (%p2063_p2) target bundleno = 959 (0x3bf), region = 36 }
  0x14   : > { %1937 = dma.vmem_to_smem (!%p1935_p5), %s155_s19, 16, %s2009_s22, [#allocation4]  }
  0x1a   : > { %2002 = dma.done.wait (%p1938_p3), [#allocation4], 16  }
  0x1b   : > { %2004 = vsyncadd (%p1938_p3), [#allocation4], 4294967280 }
  0x1c   : > { %181 = sfence }
  0x1d   : > { %p202_p0 = scmp.lt.s32.totalorder %s1754_s16, 1  ;;  %vm216_vm0 = vcmask 1042432   ;;  %v2010_v8 = vmov 0   ;;  %v229_v10 = vld [vmem:[%s2679_s1] sm:$0x7]  ;;  %vm232_vm1 = vcmask 2048   ;;  %v268_v42 = vlaneseq }
  0x1e   : > { %1966 = vset.pattern.permute.xlu1 %v2010_v8  ;;  %1967 = vset.pattern.permute.xlu0 %v2010_v8  ;;  %v230_v30 = vld [vmem:[%s2680_s2] sm:$0x7]  ;;  %vm308_vm2 = vcmask 1041408   ;;  %vm309_vm3 = vcmask 1043458   ;;  %vm311_vm4 = vcmask 832516   ;;  %v2011_v39 = vmov 0.0  }
  0x1f   : > { %s2685_s16 = smov (!%p202_p0, %s1754_s16), 1  ;;  %vm310_vm5 = vmor %vm309_vm3, %vm308_vm2  ;;  %v2012_v40 = vmov 839922192   ;;  %v2094_v44 = vshrl.u32 %v268_v42, 7  ;;  %v2013_v60 = vmov 1966171168  }
  0x20   : > { %s1928_s23 = sshll.u32 %s2685_s16, 3  ;;  %vm312_vm6 = vmor %vm311_vm4, %vm310_vm5  ;;  %v266_v41 = vunpack.c.l.s4 %v2012_v40  ;;  %v318_v61 = vunpack.c.l.s4 %v2013_v60  ;;  %s2014_s5 = smov 51   ;;  %vm338_vm7 = vcmp.ge.s32.totalorder %v268_v42, 51  ;;  %vm339_vm8 = vcmp.lt.s32.totalorder %v268_v42, 307 }
  0x21   : > { %s206_s26 = scalar_lea.vmem %s2678_s0, %s1928_s23  ;;  %313 = vst.msk [vmem:[#allocation2] sm:$0x3f] %vm312_vm6, %v2011_v39  ;;  %vm334_vm9 = vcmask 416768   ;;  %vm340_vm10 = vmand %vm338_vm7, %vm339_vm8  ;;  %s1792_s6 = sld [smem:[#allocation3 + $0xf]]  ;;  %vm415_vm11 = vcmask 916480   ;;  %vm426_vm12 = vcmask 785408  }
  0x22   : > { %v212_v0 = vld [vmem:[%s206_s26] sm:$0x77]  ;;  %v267_v43 = vunpack.c.0.s8 %v266_v41  ;;  %s1768_s7 = sld [smem:[#allocation3 + $0x7]]  ;;  %s1793_s8 = sld [smem:[#allocation3 + $0x16]]  ;;  %vm437_vm13 = vcmask 654336   ;;  %vm448_vm14 = vcmask 523264  }
  0x23   : > { %v214_v1 = vcombine.high %v212_v0, %v212_v0  ;;  %v217_v2 = vsel %vm216_vm0, %v212_v0, 0.0  ;;  %v224_v4 = vsel %vm216_vm0, %v212_v0, -inf  ;;  %s1769_s9 = sld [smem:[#allocation3 + $0xe]]  ;;  %s1794_s10 = sld [smem:[#allocation3 + $0x1d]]  ;;  %vm459_vm15 = vcmask 392192  }
  0x24   : > { %v270_v45 = vsub.s32 %v267_v43, %v2094_v44  ;;  %s1770_s11 = sld [smem:[#allocation3 + $0x15]]  ;;  %s1835_s12 = sld [smem:[#allocation3 + $0xa]]  ;;  %vm742_vm2 = vcmask 1039360   ;;  %vm924_vm6 = vcmask 1031168  }
  0x25   : > { %v218_v3 = vsel %vm216_vm0, %v214_v1, 0.0  ;;  %v225_v5 = vsel %vm216_vm0, %v214_v1, -inf  ;;  %s1771_s13 = sld [smem:[#allocation3 + $0x1c]]  ;;  %s2015_s14 = smov 96  }
  0x26   : > { %v219_v6 = vadd.f32 %v218_v3, %v217_v2  ;;  %v226_v7 = vmax.f32 %v224_v4, %v225_v5  ;;  %s2016_s17 = smov 112   ;;  %s1795_s18 = sld [smem:[#allocation3 + $0x24]] }
  0x27   : > { %s1772_s19 = sld [smem:[#allocation3 + $0x23]]  ;;  %s2017_s20 = smov 80  }
  0x28   : > { %220 = vadd.xlane.f32.xlu0 %v219_v6  ;;  %v319_v6 = vunpack.c.0.s8 %v318_v61  ;;  %s1836_s21 = sld [smem:[#allocation3 + $0x11]]  ;;  %s1791_s22 = sld [smem:[#allocation3 + $0x8]] }
  0x29   : > { %v614_v43 = vstv %s1794_s10  ;;  %s2018_s24 = smov 64   ;;  %s1881_s25 = sld [smem:[#allocation3 + $0xc]] }
  0x2a   : > { %s1814_s26 = sld [smem:[#allocation3 + $0x9]]  ;;  %s1818_s27 = sld [smem:[#allocation3 + $0x25]] }
  0x2b   : > { %s1815_s28 = sld [smem:[#allocation3 + $0x10]]  ;;  %s2019_s29 = smov 48  }
  0x2c   : > { %227 = vmax.xlane.f32.xlu0 %v226_v7  ;;  %s1860_s30 = sld [smem:[#allocation3 + $0x19]]  ;;  %s1883_s10 = sld [smem:[#allocation3 + $0x1a]] }
  0x2f   : > { %v1312_v61 = vstv %s1881_s25  ;;  %s1907_s25 = sld [smem:[#allocation3 + $0x22]] }
  0xb5   : > { %v221_v9 = vpop.xlane.xlu0 %220 }
  0xb6   : > { %v223_v11 = vmul.f32 0.00390625, %v221_v9 }
  0xb8   : > { %v231_v12 = vmul.f32 %v229_v10, %v223_v11 }
  0xb9   : > { %v228_v13 = vpop.xlane.xlu0 %227 }
  0xba   : > { %v233_v14 = vsel %vm232_vm1, %v231_v12, 0.0  ;;  %v243_v15 = vmul.f32 %v229_v10, %v228_v13 }
  0xbb   : > { %v234_v16 = vrot.slane %v233_v14, 4 }
  0xbc   : > { %v244_v17 = vsel %vm232_vm1, %v243_v15, 0.0 }
  0xbd   : > { %v235_v18 = vadd.f32 %v234_v16, %v233_v14  ;;  %v245_v19 = vrot.slane %v244_v17, 4  ;;  %v322_v16 = vsub.s32 %v319_v6, %v2094_v44 }
  0xbf   : > { %v236_v20 = vrot.slane %v235_v18, 2  ;;  %v246_v21 = vadd.f32 %v245_v19, %v244_v17 }
  0xc1   : > { %v237_v22 = vadd.f32 %v236_v20, %v235_v18  ;;  %v247_v23 = vrot.slane %v246_v21, 2 }
  0xc3   : > { %v238_v24 = vrot.slane %v237_v22, 1  ;;  %v248_v25 = vadd.f32 %v247_v23, %v246_v21 }
  0xc5   : > { %v239_v26 = vadd.f32 %v238_v24, %v237_v22  ;;  %v249_v27 = vrot.slane %v248_v25, 1 }
  0xc7   : > { %v240_v28 = vmax.f32 %v239_v26, 0.0  ;;  %v250_v29 = vadd.f32 %v249_v27, %v248_v25 }
  0xc9   : > { %v251_v31 = vmax.f32 %v250_v29, 0.0  ;;  %v241_v32 = vmul.f32 %v240_v28, %v230_v30 }
  0xcb   : > { %v252_v33 = vmul.f32 %v251_v31, %v230_v30 }
  0xcd   : > { %v254_v34 = vadd.f32 %v252_v33, %v241_v32  ;;  %v594_v32 = vstv %s1792_s6  ;;  %v409_v33 = vstv %s1768_s7  ;;  %s1904_s6 = sld [smem:[#allocation3 + $0xd]]  ;;  %s1858_s7 = sld [smem:[#allocation3 + $0xb]] }
  0xcf   : > { %v1765_v35 = vmul.f32 -1.442695, %v254_v34 }
  0xd1   : > { %1969 = vpow2.f32 %v1765_v35 }
  0xdb   : > { %v1970_v36 = vpop.eup %1969 }
  0xdc   : > { %v258_v37 = vadd.f32 1.0, %v1970_v36 }
  0xde   : > { %1971 = vrcp.f32 %v258_v37  ;;  %v604_v37 = vstv %s1793_s8  ;;  %s1838_s8 = sld [smem:[#allocation3 + $0x1f]] }
  0xe8   : > { %v1972_v38 = vpop.eup %1971 }
  0xe9   : > { %263 = vperm.xlu1 %1966, %v1972_v38   ;;  %v420_v38 = vstv %s1769_s9  ;;  %s1817_s9 = sld [smem:[#allocation3 + $0x1e]] }
 0x168   : > { %v264_v46 = vpop.permute.xlu1 %263 }
 0x169   : > { %v271_v47 = vrot.slane %v264_v46, %v270_v45  ;;  %v431_v45 = vstv %s1770_s11  ;;  %s1859_s11 = sld [smem:[#allocation3 + $0x12]] }
 0x16b   : > { %v2097_v48 = vmul.f32 %v271_v47, %v212_v0 }
 0x16d   : > { %v275_v49 = vcombine.high %v2097_v48, %v2097_v48  ;;  %v277_v50 = vsel %vm216_vm0, %v2097_v48, 0.0  ;;  %v294_v51 = vsel %vm216_vm0, %v2097_v48, -inf }
 0x16e   : > { %v278_v52 = vrot.slane %v277_v50, 4  ;;  %v295_v53 = vrot.slane %v294_v51, 4 }
 0x16f   : > { %v284_v54 = vsel %vm216_vm0, %v275_v49, 0.0  ;;  %v301_v55 = vsel %vm216_vm0, %v275_v49, -inf  ;;  %v948_v49 = vstv %s1835_s12  ;;  %s1862_s12 = sld [smem:[#allocation3 + $0x27]]  ;;  %vm470_vm0 = vcmask 261120  }
 0x170   : > { %v279_v56 = vadd.f32 %v278_v52, %v277_v50  ;;  %v285_v57 = vrot.slane %v284_v54, 4  ;;  %v296_v58 = vmax.f32 %v294_v51, %v295_v53  ;;  %v302_v59 = vrot.slane %v301_v55, 4 }
 0x171   : > { %v442_v50 = vstv %s1771_s13  ;;  %v624_v53 = vstv %s1795_s18  ;;  %s1796_s13 = sld [smem:[#allocation3 + $0x2b]] }
 0x172   : > { %v297_v62 = vrot.slane %v296_v58, 2  ;;  %v303_v63 = vmax.f32 %v301_v55, %v302_v59  ;;  %v280_v0 = vrot.slane %v279_v56, 2  ;;  %v286_v1 = vadd.f32 %v285_v57, %v284_v54  ;;  %s1906_s18 = sld [smem:[#allocation3 + $0x1b]] }
 0x173   : > { %v453_v54 = vstv %s1772_s19  ;;  %v958_v57 = vstv %s1836_s21  ;;  %s1837_s19 = sld [smem:[#allocation3 + $0x18]]  ;;  %s1863_s21 = sld [smem:[#allocation3 + $0x2e]] }
 0x174   : > { %v298_v2 = vmax.f32 %v296_v58, %v297_v62  ;;  %v304_v3 = vrot.slane %v303_v63, 2  ;;  %v281_v4 = vadd.f32 %v280_v0, %v279_v56  ;;  %v287_v5 = vrot.slane %v286_v1, 2 }
 0x175   : > { %v584_v58 = vstv %s1791_s22  ;;  %v766_v62 = vstv %s1814_s26  ;;  %s1882_s22 = sld [smem:[#allocation3 + $0x13]]  ;;  %s1819_s26 = sld [smem:[#allocation3 + $0x2c]] }
 0x176   : > { %v299_v7 = vrot.slane %v298_v2, 1  ;;  %v305_v8 = vmax.f32 %v303_v63, %v304_v3  ;;  %v282_v9 = vrot.slane %v281_v4, 1  ;;  %v288_v10 = vadd.f32 %v287_v5, %v286_v1 }
 0x177   : > { %v806_v1 = vstv %s1818_s27  ;;  %v1150_v5 = vstv %s1860_s30  ;;  %s2020_s27 = smov 32   ;;  %s1861_s30 = sld [smem:[#allocation3 + $0x20]] }
 0x178   : > { %v306_v11 = vrot.slane %v305_v8, 1  ;;  %v283_v12 = vadd.f32 %v282_v9, %v281_v4  ;;  %v289_v13 = vrot.slane %v288_v10, 1  ;;  %v300_v14 = vmax.f32 %v298_v2, %v299_v7 }
 0x179   : > { %v776_v2 = vstv %s1815_s28  ;;  %v1494_v9 = vstv %s1904_s6  ;;  %s1908_s28 = sld [smem:[#allocation3 + $0x29]]  ;;  %s1905_s6 = sld [smem:[#allocation3 + $0x14]] }
 0x17a   : > { %v307_v15 = vmax.f32 %v305_v8, %v306_v11  ;;  %v290_v17 = vadd.f32 %v289_v13, %v288_v10  ;;  %v292_v19 = vmul.f32 0.33333334, %v283_v12  ;;  %v1130_v10 = vstv %s1858_s7  ;;  %s1822_s7 = sld [smem:[#allocation3 + $0x3a]] }
 0x17b   : > { %v978_v13 = vstv %s1838_s8  ;;  %s1839_s8 = sld [smem:[#allocation3 + $0x26]] }
 0x17c   : > { %v344_v18 = vcombine.low %v300_v14, %v307_v15  ;;  %v293_v20 = vmul.f32 0.33333334, %v290_v17  ;;  %v796_v14 = vstv %s1817_s9  ;;  %v1332_v17 = vstv %s1883_s10  ;;  %s1824_s9 = sld [smem:[#allocation3 + $0x41]] }
 0x17d   : > { %s1884_s10 = sld [smem:[#allocation3 + $0x21]] }
 0x17e   : > { %v351_v21 = vrot.slane %v344_v18, %v322_v16  ;;  %v316_v22 = vcombine.low %v292_v19, %v293_v20  ;;  %v1140_v18 = vstv %s1859_s11  ;;  %s1826_s11 = sld [smem:[#allocation3 + $0x48]] }
 0x180   : > { %v358_v23 = vrot.slane %v351_v21, %v322_v16  ;;  %v323_v24 = vrot.slane %v316_v22, %v322_v16  ;;  %v1170_v21 = vstv %s1862_s12  ;;  %v634_v22 = vstv %s1796_s13  ;;  %s1840_s12 = sld [smem:[#allocation3 + $0x2d]]  ;;  %s1866_s13 = sld [smem:[#allocation3 + $0x3c]] }
 0x182   : > { %359 = vrot.lane.b32.xlu0 %v358_v23, %s2014_s5  ;;  %v330_v25 = vrot.slane %v323_v24, %v322_v16 }
 0x184   : > { %331 = vrot.lane.b32.xlu1 %v330_v25, %s2014_s5  ;;  %s1816_s5 = sld [smem:[#allocation3 + $0x17]]  ;;  %v1514_v25 = vstv %s1906_s18  ;;  %s1885_s18 = sld [smem:[#allocation3 + $0x28]] }
 0x18a   : > { %v786_v6 = vstv %s1816_s5  ;;  %s1799_s5 = sld [smem:[#allocation3 + $0x39]] }
 0x1f4   : > { %v360_v26 = vpop.permute.xlu0 %359 }
 0x1f5   : > { %v361_v27 = vrot.slane %v360_v26, 7 }
 0x1f6   : > { %v332_v28 = vpop.permute.xlu1 %331 }
 0x1f7   : > { %v362_v29 = vsel %vm334_vm9, %v361_v27, %v360_v26  ;;  %v333_v30 = vrot.slane %v332_v28, 7  ;;  %v968_v26 = vstv %s1837_s19  ;;  %s1807_s19 = sld [smem:[#allocation3 + $0x55]] }
 0x1f8   : > { %365 = vst.msk [vmem:[#allocation2 + $0x1] ss:$2 sm:$0x7] %vm340_vm10, %v362_v29  ;;  %v1180_v29 = vstv %s1863_s21  ;;  %s1886_s21 = sld [smem:[#allocation3 + $0x2f]] }
 0x1f9   : > { %v335_v31 = vsel %vm334_vm9, %v333_v30, %v332_v28  ;;  %v1322_v30 = vstv %s1882_s22  ;;  %s1845_s22 = sld [smem:[#allocation3 + $0x42]] }
 0x1fa   : > { %341 = vst.msk [vmem:[#allocation2] ss:$2 sm:$0x7] %vm340_vm10, %v335_v31  ;;  %vm1288_vm10 = vcmask 1014784  }
 0x201   : > { %v2110_v34 = vld [vmem:[#allocation2] sm:$0x3f] }
 0x202   : > { %v595_v35 = vmul.f32 %v594_v32, %v2110_v34  ;;  %v410_v36 = vmul.f32 %v409_v33, %v2110_v34  ;;  %v605_v40 = vmul.f32 %v604_v37, %v2110_v34  ;;  %v421_v41 = vmul.f32 %v420_v38, %v2110_v34 }
 0x203   : > { %v615_v46 = vmul.f32 %v614_v43, %v2110_v34  ;;  %v432_v47 = vmul.f32 %v431_v45, %v2110_v34  ;;  %v949_v51 = vmul.f32 %v948_v49, %v2110_v34  ;;  %v443_v52 = vmul.f32 %v442_v50, %v2110_v34 }
 0x204   : > { %597 = vrot.lane.b32.xlu0 %v595_v35, %s2015_s14  ;;  %412 = vrot.lane.b32.xlu1 %v410_v36, %s2016_s17  ;;  %v625_v55 = vmul.f32 %v624_v53, %v2110_v34  ;;  %v454_v56 = vmul.f32 %v453_v54, %v2110_v34  ;;  %v959_v59 = vmul.f32 %v958_v57, %v2110_v34  ;;  %v1524_v33 = vstv %s1907_s25  ;;  %s1909_s25 = sld [smem:[#allocation3 + $0x30]] }
 0x205   : > { %v585_v60 = vmul.f32 %v584_v58, %v2110_v34  ;;  %v1313_v63 = vmul.f32 %v1312_v61, %v2110_v34  ;;  %v767_v0 = vmul.f32 %v766_v62, %v2110_v34  ;;  %v807_v3 = vmul.f32 %v806_v1, %v2110_v34 }
 0x206   : > { %v777_v4 = vmul.f32 %v776_v2, %v2110_v34  ;;  %v1151_v7 = vmul.f32 %v1150_v5, %v2110_v34  ;;  %v787_v8 = vmul.f32 %v786_v6, %v2110_v34  ;;  %v1495_v11 = vmul.f32 %v1494_v9, %v2110_v34 }
 0x207   : > { %v1131_v12 = vmul.f32 %v1130_v10, %v2110_v34  ;;  %v979_v15 = vmul.f32 %v978_v13, %v2110_v34  ;;  %v797_v16 = vmul.f32 %v796_v14, %v2110_v34  ;;  %v1333_v19 = vmul.f32 %v1332_v17, %v2110_v34 }
 0x208   : > { %607 = vrot.lane.b32.xlu0 %v605_v40, %s2017_s20  ;;  %423 = vrot.lane.b32.xlu1 %v421_v41, %s2015_s14  ;;  %v1141_v20 = vmul.f32 %v1140_v18, %v2110_v34  ;;  %v1171_v23 = vmul.f32 %v1170_v21, %v2110_v34  ;;  %v635_v24 = vmul.f32 %v634_v22, %v2110_v34  ;;  %v816_v35 = vstv %s1819_s26  ;;  %s1889_s26 = sld [smem:[#allocation3 + $0x3d]] }
 0x209   : > { %v1515_v27 = vmul.f32 %v1514_v25, %v2110_v34  ;;  %v969_v28 = vmul.f32 %v968_v26, %v2110_v34  ;;  %v1181_v31 = vmul.f32 %v1180_v29, %v2110_v34  ;;  %v1323_v32 = vmul.f32 %v1322_v30, %v2110_v34 }
 0x20a   : > { %v1525_v36 = vmul.f32 %v1524_v33, %v2110_v34  ;;  %v817_v37 = vmul.f32 %v816_v35, %v2110_v34  ;;  %v1534_v38 = vstv %s1908_s28  ;;  %v1160_v40 = vstv %s1861_s30  ;;  %s1801_s28 = sld [smem:[#allocation3 + $0x40]]  ;;  %s1830_s30 = sld [smem:[#allocation3 + $0x56]] }
 0x20b   : > { %v652_v41 = vstv %s1799_s5  ;;  %v1535_v43 = vmul.f32 %v1534_v38, %v2110_v34  ;;  %v1161_v45 = vmul.f32 %v1160_v40, %v2110_v34  ;;  %v834_v49 = vstv %s1822_s7  ;;  %s1803_s5 = sld [smem:[#allocation3 + $0x47]]  ;;  %s1805_s7 = sld [smem:[#allocation3 + $0x4e]] }
 0x20c   : > { %617 = vrot.lane.b32.xlu0 %v615_v46, %s2018_s24  ;;  %434 = vrot.lane.b32.xlu1 %v432_v47, %s2017_s20  ;;  %v653_v46 = vmul.f32 %v652_v41, %v2110_v34  ;;  %v1504_v47 = vstv %s1905_s6  ;;  %v988_v53 = vstv %s1839_s8  ;;  %s1870_s6 = sld [smem:[#allocation3 + $0x4a]]  ;;  %s1912_s8 = sld [smem:[#allocation3 + $0x3e]] }
 0x20d   : > { %v846_v54 = vstv %s1824_s9  ;;  %v1342_v58 = vstv %s1884_s10  ;;  %v700_v5 = vstv %s1807_s19  ;;  %v1362_v9 = vstv %s1886_s21  ;;  %s1843_s9 = sld [smem:[#allocation3 + $0x3b]]  ;;  %s1849_s10 = sld [smem:[#allocation3 + $0x50]] }
 0x20e   : > { %v1800_v50 = vrot.slane %v653_v46, 9  ;;  %v847_v57 = vmul.f32 %v846_v54, %v2110_v34  ;;  %v1343_v61 = vmul.f32 %v1342_v58, %v2110_v34  ;;  %v1028_v10 = vstv %s1845_s22  ;;  %s1809_s19 = sld [smem:[#allocation3 + $0x5c]]  ;;  %s2224_s21 = sld [smem:[#allocation3 + $0x52]] }
 0x20f   : > { %v1029_v13 = vmul.f32 %v1028_v10, %v2110_v34  ;;  %v1544_v14 = vstv %s1909_s25  ;;  %s2226_s22 = sld [smem:[#allocation3 + $0x49]]  ;;  %s2232_s25 = sld [smem:[#allocation3 + $0x5e]] }
 0x210   : > { %951 = vrot.lane.b32.xlu0 %v949_v51, %s2016_s17  ;;  %445 = vrot.lane.b32.xlu1 %v443_v52, %s2018_s24  ;;  %v1505_v51 = vmul.f32 %v1504_v47, %v2110_v34  ;;  %v835_v52 = vmul.f32 %v834_v49, %v2110_v34  ;;  %v1545_v18 = vmul.f32 %v1544_v14, %v2110_v34  ;;  %v882_v21 = vstv %s1830_s30  ;;  %s2248_s30 = sld [smem:[#allocation3 + $0x5d]] }
 0x211   : > { %v1846_v17 = vrot.slane %v1029_v13, 9  ;;  %v676_v22 = vstv %s1803_s5  ;;  %v883_v25 = vmul.f32 %v882_v21, %v2110_v34  ;;  %s2252_s5 = sld [smem:[#allocation3 + $0x3]] }
 0x212   : > { %v677_v26 = vmul.f32 %v676_v22, %v2110_v34  ;;  %v1562_v33 = vstv %s1912_s8  ;;  %s2268_s8 = sld [smem:[#allocation3 + $0x1]] }
 0x213   : > { %v1831_v29 = vrot.slane %v883_v25, 9  ;;  %v1016_v35 = vstv %s1843_s9  ;;  %v1563_v38 = vmul.f32 %v1562_v33, %v2110_v34  ;;  %v1052_v41 = vstv %s1849_s10  ;;  %s2270_s9 = sld [smem:[#allocation3 + $0x5]]  ;;  %s2278_s10 = sld [smem:[#allocation3 + $0x2]] }
 0x214   : > { %627 = vrot.lane.b32.xlu0 %v625_v55, %s2019_s29  ;;  %456 = vrot.lane.b32.xlu1 %v454_v56, %s2019_s29  ;;  %v1823_v55 = vrot.slane %v835_v52, 9  ;;  %v989_v56 = vmul.f32 %v988_v53, %v2110_v34  ;;  %v1804_v30 = vrot.slane %v677_v26, 9  ;;  %v1017_v40 = vmul.f32 %v1016_v35, %v2110_v34 }
 0x215   : > { %v1053_v47 = vmul.f32 %v1052_v41, %v2110_v34 }
 0x216   : > { %v1844_v46 = vrot.slane %v1017_v40, 9 }
 0x217   : > { %v1850_v52 = vrot.slane %v1053_v47, 9 }
 0x218   : > { %961 = vrot.lane.b32.xlu0 %v959_v59, %s2015_s14  ;;  %587 = vrot.lane.b32.xlu1 %v585_v60, %s2016_s17  ;;  %v858_v59 = vstv %s1826_s11  ;;  %v1825_v60 = vrot.slane %v847_v57, 9  ;;  %s1828_s11 = sld [smem:[#allocation3 + $0x4f]]  ;;  %v712_v57 = vstv %s1809_s19  ;;  %s2292_s19 = sld [smem:[#allocation3 + $0x46]] }
 0x219   : > { %v859_v62 = vmul.f32 %v858_v59, %v2110_v34  ;;  %v762_v41 = vstv %s2278_s10  ;;  %s2021_s10 = smov 127  }
 0x21b   : > { %v1827_v1 = vrot.slane %v859_v62, 9 }
 0x21c   : > { %1315 = vrot.lane.b32.xlu0 %v1313_v63, %s2016_s17  ;;  %769 = vrot.lane.b32.xlu1 %v767_v0, %s2016_s17  ;;  %v998_v63 = vstv %s1840_s12  ;;  %v1198_v0 = vstv %s1866_s13  ;;  %s1893_s12 = sld [smem:[#allocation3 + $0x4b]] }
 0x21d   : > { %v999_v2 = vmul.f32 %v998_v63, %v2110_v34  ;;  %s1868_s13 = sld [smem:[#allocation3 + $0x43]]  ;;  %v713_v63 = vmul.f32 %v712_v57, %v2110_v34 }
 0x220   : > { %809 = vrot.lane.b32.xlu0 %v807_v3, %s2019_s29  ;;  %779 = vrot.lane.b32.xlu1 %v777_v4, %s2015_s14  ;;  %v1199_v3 = vmul.f32 %v1198_v0, %v2110_v34  ;;  %v1352_v4 = vstv %s1885_s18  ;;  %s1851_s18 = sld [smem:[#allocation3 + $0x57]]  ;;  %v1416_v0 = vstv %s2224_s21  ;;  %s2296_s21 = sld [smem:[#allocation3 + $0x4c]] }
 0x222   : > { %v1867_v6 = vrot.slane %v1199_v3, 9 }
 0x224   : > { %1153 = vrot.lane.b32.xlu0 %v1151_v7, %s2017_s20  ;;  %789 = vrot.lane.b32.xlu1 %v787_v8, %s2017_s20  ;;  %v1353_v7 = vmul.f32 %v1352_v4, %v2110_v34  ;;  %v701_v8 = vmul.f32 %v700_v5, %v2110_v34  ;;  %v1810_v5 = vrot.slane %v713_v63, 9 }
 0x228   : > { %1497 = vrot.lane.b32.xlu0 %v1495_v11, %s2016_s17  ;;  %1133 = vrot.lane.b32.xlu1 %v1131_v12, %s2016_s17  ;;  %v1808_v11 = vrot.slane %v701_v8, 9  ;;  %v1363_v12 = vmul.f32 %v1362_v9, %v2110_v34  ;;  %v1076_v8 = vstv %s2232_s25  ;;  %s2330_s25 = sld [smem:[#allocation3 + $0x5f]] }
 0x229   : > { %v1077_v14 = vmul.f32 %v1076_v8, %v2110_v34 }
 0x22b   : > { %v1854_v22 = vrot.slane %v1077_v14, 9 }
 0x22c   : > { %981 = vrot.lane.b32.xlu0 %v979_v15, %s2018_s24  ;;  %799 = vrot.lane.b32.xlu1 %v797_v16, %s2018_s24  ;;  %v1380_v15 = vstv %s1889_s26  ;;  %v664_v16 = vstv %s1801_s28  ;;  %s2234_s26 = sld [smem:[#allocation3 + $0x44]]  ;;  %s2246_s28 = sld [smem:[#allocation3 + $0x59]] }
 0x230   : > { %1335 = vrot.lane.b32.xlu0 %v1333_v19, %s2017_s20  ;;  %1143 = vrot.lane.b32.xlu1 %v1141_v20, %s2015_s14  ;;  %v1381_v19 = vmul.f32 %v1380_v15, %v2110_v34  ;;  %v665_v20 = vmul.f32 %v664_v16, %v2110_v34 }
 0x232   : > { %v1392_v9 = vstv %s2234_s26  ;;  %v1428_v16 = vstv %s2246_s28  ;;  %s2346_s26 = sld [smem:[#allocation3 + $0x53]]  ;;  %s2357_s28 = sld [smem:[#allocation3 + $0x6]] }
 0x233   : > { %v1393_v15 = vmul.f32 %v1392_v9, %v2110_v34 }
 0x234   : > { %1173 = vrot.lane.b32.xlu0 %v1171_v23, %s2019_s29  ;;  %637 = vrot.lane.b32.xlu1 %v635_v24, %s2020_s27  ;;  %v1890_v23 = vrot.slane %v1381_v19, 9  ;;  %v1802_v24 = vrot.slane %v665_v20, 9 }
 0x238   : > { %1517 = vrot.lane.b32.xlu0 %v1515_v27, %s2017_s20  ;;  %971 = vrot.lane.b32.xlu1 %v969_v28, %s2017_s20  ;;  %v1222_v27 = vstv %s1870_s6  ;;  %v688_v28 = vstv %s1805_s7  ;;  %s2254_s6 = sld [smem:[#allocation3 + $0x60]]  ;;  %s2264_s7 = sld [smem:[#allocation3 + $0x51]] }
 0x23c   : > { %1183 = vrot.lane.b32.xlu0 %v1181_v31, %s2020_s27  ;;  %1325 = vrot.lane.b32.xlu1 %v1323_v32, %s2015_s14  ;;  %v1223_v31 = vmul.f32 %v1222_v27, %v2110_v34  ;;  %v689_v32 = vmul.f32 %v688_v28, %v2110_v34 }
 0x23e   : > { %v1440_v19 = vstv %s2254_s6  ;;  %v1234_v27 = vstv %s2264_s7  ;;  %s2391_s6 = sld [smem:[#allocation3 + $0x3f]]  ;;  %s2394_s7 = sld [smem:[#allocation3 + $0x32]] }
 0x23f   : > { %v1235_v40 = vmul.f32 %v1234_v27, %v2110_v34 }
 0x240   : > { %1527 = vrot.lane.b32.xlu0 %v1525_v36, %s2018_s24  ;;  %819 = vrot.lane.b32.xlu1 %v817_v37, %s2020_s27  ;;  %v1871_v36 = vrot.slane %v1223_v31, 9  ;;  %v1806_v37 = vrot.slane %v689_v32, 9  ;;  %v1441_v31 = vmul.f32 %v1440_v19, %v2110_v34  ;;  %v1308_v32 = vstv %s2270_s9  ;;  %s1864_s9 = sld [smem:[#allocation3 + $0x35]] }
 0x241   : > { %v1309_v63 = vmul.f32 %v1308_v32, %v2110_v34 }
 0x244   : > { %1537 = vrot.lane.b32.xlu0 %v1535_v43, %s2019_s29  ;;  %1163 = vrot.lane.b32.xlu1 %v1161_v45, %s2018_s24  ;;  %v870_v43 = vstv %s1828_s11  ;;  %v1913_v45 = vrot.slane %v1563_v38, 9  ;;  %s2280_s11 = sld [smem:[#allocation3 + $0x61]] }
 0x245   : > { %v871_v49 = vmul.f32 %v870_v43, %v2110_v34 }
 0x247   : > { %v1829_v53 = vrot.slane %v871_v49, 9  ;;  %v507_v49 = vstv %s2292_s19  ;;  %s2024_s19 = smov 124  }
 0x248   : > { %657 = vrot.lane.b32.xlu0 %v1800_v50, %s2016_s17  ;;  %1507 = vrot.lane.b32.xlu1 %v1505_v51, %s2015_s14  ;;  %v1404_v50 = vstv %s1893_s12  ;;  %v1210_v51 = vstv %s1868_s13  ;;  %s2284_s12 = sld [smem:[#allocation3 + $0x45]]  ;;  %s2286_s13 = sld [smem:[#allocation3 + $0x38]] }
 0x249   : > { %v1405_v54 = vmul.f32 %v1404_v50, %v2110_v34  ;;  %v1586_v50 = vstv %s2296_s21  ;;  %s2025_s21 = smov 123  }
 0x24a   : > { %v1622_v43 = vstv %s2280_s11  ;;  %s2022_s11 = smov 126  }
 0x24c   : > { %839 = vrot.lane.b32.xlu0 %v1823_v55, %s2016_s17  ;;  %991 = vrot.lane.b32.xlu1 %v989_v56, %s2019_s29  ;;  %v1211_v55 = vmul.f32 %v1210_v51, %v2110_v34  ;;  %v1064_v56 = vstv %s1851_s18  ;;  %s2290_s18 = sld [smem:[#allocation3 + $0x58]] }
 0x24d   : > { %v1065_v62 = vmul.f32 %v1064_v56, %v2110_v34 }
 0x24f   : > { %v1852_v4 = vrot.slane %v1065_v62, 9 }
 0x250   : > { %851 = vrot.lane.b32.xlu0 %v1825_v60, %s2015_s14  ;;  %1345 = vrot.lane.b32.xlu1 %v1343_v61, %s2018_s24  ;;  %v1894_v60 = vrot.slane %v1405_v54, 9  ;;  %v1869_v61 = vrot.slane %v1211_v55, 9  ;;  %v1873_v54 = vrot.slane %v1235_v40, 9  ;;  %v1623_v55 = vmul.f32 %v1622_v43, %v2110_v34 }
 0x251   : > { %v1258_v40 = vstv %s2330_s25 }
 0x252   : > { %v1246_v47 = vstv %s2290_s18  ;;  %v1923_v14 = vrot.slane %v1623_v55, 9  ;;  %v1598_v55 = vstv %s2346_s26  ;;  %s2590_s18 = sld [smem:[#allocation3 + $0x31]] }
 0x254   : > { %863 = vrot.lane.b32.xlu0 %v1827_v1, %s2017_s20  ;;  %1001 = vrot.lane.b32.xlu1 %v999_v2, %s2020_s27  ;;  %v1040_v1 = vstv %s2226_s22  ;;  %s2326_s22 = sld [smem:[#allocation3 + $0x54]] }
 0x258   : > { %1203 = vrot.lane.b32.xlu0 %v1867_v6, %s2016_s17  ;;  %1355 = vrot.lane.b32.xlu1 %v1353_v7, %s2019_s29  ;;  %v1417_v6 = vmul.f32 %v1416_v0, %v2110_v34  ;;  %v1041_v7 = vmul.f32 %v1040_v1, %v2110_v34  ;;  %v763_v0 = vmul.f32 %v762_v41, %v2110_v34 }
 0x25a   : > { %v1848_v13 = vrot.slane %v1041_v7, 9  ;;  %v1247_v7 = vmul.f32 %v1246_v47, %v2110_v34 }
 0x25c   : > { %705 = vrot.lane.b32.xlu0 %v1808_v11, %s2019_s29  ;;  %1365 = vrot.lane.b32.xlu1 %v1363_v12, %s2020_s27  ;;  %v1896_v12 = vrot.slane %v1417_v6, 9 }
 0x260   : > { %1033 = vrot.lane.b32.xlu0 %v1846_v17, %s2015_s14  ;;  %1547 = vrot.lane.b32.xlu1 %v1545_v18, %s2020_s27  ;;  %v894_v17 = vstv %s2248_s30  ;;  %v944_v18 = vstv %s2252_s5  ;;  %s2359_s30 = sld [smem:[#allocation3 + $0x4]]  ;;  %s2369_s5 = sld [smem:[#allocation3 + $0x5a]] }
 0x261   : > { %v895_v25 = vmul.f32 %v894_v17, %v2110_v34  ;;  %v945_v28 = vmul.f32 %v944_v18, %v2110_v34 }
 0x263   : > { %v1833_v38 = vrot.slane %v895_v25, 9 }
 0x264   : > { %1385 = vrot.lane.b32.xlu0 %v1890_v23, %s2016_s17  ;;  %669 = vrot.lane.b32.xlu1 %v1802_v24, %s2015_s14  ;;  %v1892_v23 = vrot.slane %v1393_v15, 9  ;;  %v1429_v24 = vmul.f32 %v1428_v16, %v2110_v34 }
 0x268   : > { %887 = vrot.lane.b32.xlu0 %v1831_v29, %s2019_s29  ;;  %681 = vrot.lane.b32.xlu1 %v1804_v30, %s2017_s20  ;;  %v580_v30 = vstv %s2268_s8  ;;  %s2415_s8 = sld [smem:[#allocation3 + $0x5b]] }
 0x26c   : > { %1227 = vrot.lane.b32.xlu0 %v1871_v36, %s2017_s20  ;;  %693 = vrot.lane.b32.xlu1 %v1806_v37, %s2018_s24  ;;  %v1898_v37 = vrot.slane %v1429_v24, 9  ;;  %v1587_v24 = vmul.f32 %v1586_v50, %v2110_v34 }
 0x270   : > { %1567 = vrot.lane.b32.xlu0 %v1913_v45, %s2016_s17  ;;  %1021 = vrot.lane.b32.xlu1 %v1844_v46, %s2016_s17  ;;  %v1574_v45 = vstv %s2284_s12  ;;  %v483_v46 = vstv %s2286_s13  ;;  %s2564_s12 = sld [smem:[#allocation3]]  ;;  %s2023_s13 = smov 125  }
 0x271   : > { %v1575_v56 = vmul.f32 %v1574_v45, %v2110_v34  ;;  %v484_v1 = vmul.f32 %v483_v46, %v2110_v34 }
 0x273   : > { %v1915_v15 = vrot.slane %v1575_v56, 9  ;;  %v1490_v56 = vstv %s2357_s28  ;;  %s211_s28 = scalar_lea.vmem %s2682_s4, %s1928_s23 }
 0x274   : > { %1057 = vrot.lane.b32.xlu0 %v1850_v52, %s2018_s24  ;;  %875 = vrot.lane.b32.xlu1 %v1829_v53, %s2018_s24  ;;  %v1900_v53 = vrot.slane %v1441_v31, 9 }
 0x276   : > { %v2238_v58 = vpop.permute.xlu0 %597  ;;  %v2240_v59 = vpop.permute.xlu1 %412 }
 0x277   : > { %v599_v57 = vrot.slane %v2238_v58, 2 }
 0x278   : > { %1409 = vrot.lane.b32.xlu0 %v1894_v60, %s2017_s20  ;;  %1215 = vrot.lane.b32.xlu1 %v1869_v61, %s2015_s14  ;;  %v581_v61 = vmul.f32 %v580_v30, %v2110_v34 }
 0x279   : > { %v600_v16 = vsel %vm426_vm12, %v2238_v58, %v599_v57  ;;  %v1126_v57 = vstv %s2359_s30 }
 0x27a   : > { %v2256_v2 = vpop.permute.xlu0 %607  ;;  %v2258_v3 = vpop.permute.xlu1 %423 }
 0x27c   : > { %1069 = vrot.lane.b32.xlu0 %v1852_v4, %s2019_s29  ;;  %717 = vrot.lane.b32.xlu1 %v1810_v5, %s2020_s27  ;;  %v609_v4 = vrot.slane %v2256_v2, 2 }
 0x27e   : > { %v2272_v10 = vpop.permute.xlu0 %617  ;;  %v2274_v11 = vpop.permute.xlu1 %434  ;;  %v610_v58 = vsel %vm437_vm13, %v2256_v2, %v609_v4 }
 0x27f   : > { %v619_v17 = vrot.slane %v2272_v10, 2 }
 0x280   : > { %1421 = vrot.lane.b32.xlu0 %v1896_v12, %s2018_s24  ;;  %1045 = vrot.lane.b32.xlu1 %v1848_v13, %s2017_s20 }
 0x281   : > { %v620_v2 = vsel %vm448_vm14, %v2272_v10, %v619_v17  ;;  %v1917_v10 = vrot.slane %v1587_v24, 9 }
 0x282   : > { %v952_v20 = vpop.permute.xlu0 %951  ;;  %v2298_v21 = vpop.permute.xlu1 %445 }
 0x283   : > { %v953_v26 = vrot.slane %v952_v20, 2 }
 0x284   : > { %1081 = vrot.lane.b32.xlu0 %v1854_v22, %s2020_s27  ;;  %1397 = vrot.lane.b32.xlu1 %v1892_v23, %s2015_s14  ;;  %v1777_v22 = vrot.slane %v484_v1, 9  ;;  %v508_v23 = vmul.f32 %v507_v49, %v2110_v34  ;;  %v1599_v1 = vmul.f32 %v1598_v55, %v2110_v34 }
 0x285   : > { %v954_v29 = vsel %vm415_vm11, %v952_v20, %v953_v26 }
 0x286   : > { %v956_v33 = vadd.f32 %v954_v29, %v945_v28  ;;  %v2310_v35 = vpop.permute.xlu0 %627  ;;  %v2312_v36 = vpop.permute.xlu1 %456  ;;  %v1781_v46 = vrot.slane %v508_v23, 9 }
 0x287   : > { %v629_v25 = vrot.slane %v2310_v35, 2 }
 0x288   : > { %1433 = vrot.lane.b32.xlu0 %v1898_v37, %s2019_s29  ;;  %899 = vrot.lane.b32.xlu1 %v1833_v38, %s2020_s27  ;;  %v531_v38 = vstv %s2326_s22  ;;  %s2026_s22 = smov 122  }
 0x289   : > { %v630_v43 = vsel %vm459_vm15, %v2310_v35, %v629_v25 }
 0x28a   : > { %v962_v51 = vpop.permute.xlu0 %961  ;;  %v588_v52 = vpop.permute.xlu1 %587 }
 0x28b   : > { %v963_v60 = vrot.slane %v962_v51, 2  ;;  %v589_v62 = vrot.slane %v588_v52, 2 }
 0x28c   : > { %1445 = vrot.lane.b32.xlu0 %v1900_v53, %s2020_s27  ;;  %1239 = vrot.lane.b32.xlu1 %v1873_v54, %s2018_s24 }
 0x28d   : > { %v964_v5 = vsel %vm426_vm12, %v962_v51, %v963_v60  ;;  %v590_v6 = vsel %vm415_vm11, %v588_v52, %v589_v62  ;;  %v532_v51 = vmul.f32 %v531_v38, %v2110_v34  ;;  %v1259_v52 = vmul.f32 %v1258_v40, %v2110_v34 }
 0x28e   : > { %v2341_v8 = vadd.f32 %v964_v5, %v956_v33  ;;  %v592_v9 = vadd.f32 %v590_v6, %v581_v61  ;;  %v1316_v12 = vpop.permute.xlu0 %1315  ;;  %v770_v13 = vpop.permute.xlu1 %769  ;;  %v1875_v33 = vrot.slane %v1247_v7, 9  ;;  %v1610_v6 = vstv %s2369_s5 }
 0x28f   : > { %v1317_v18 = vrot.slane %v1316_v12, 2  ;;  %v771_v19 = vrot.slane %v770_v13, 2  ;;  %v1491_v7 = vmul.f32 %v1490_v56, %v2110_v34 }
 0x290   : > { %v602_v20 = vadd.f32 %v600_v16, %v592_v9  ;;  %1627 = vrot.lane.b32.xlu0 %v1923_v14, %s2020_s27  ;;  %1579 = vrot.lane.b32.xlu1 %v1915_v15, %s2015_s14  ;;  %v1127_v9 = vmul.f32 %v1126_v57, %v2110_v34 }
 0x291   : > { %v1318_v26 = vsel %vm415_vm11, %v1316_v12, %v1317_v18  ;;  %v772_v27 = vsel %vm415_vm11, %v770_v13, %v771_v19  ;;  %v1919_v18 = vrot.slane %v1599_v1, 9  ;;  %v1611_v19 = vmul.f32 %v1610_v6, %v2110_v34 }
 0x292   : > { %v612_v28 = vadd.f32 %v610_v58, %v602_v20  ;;  %v2361_v29 = vadd.f32 %v1318_v26, %v1309_v63  ;;  %v774_v30 = vadd.f32 %v772_v27, %v763_v0  ;;  %v2363_v31 = vpop.permute.xlu0 %809  ;;  %v780_v32 = vpop.permute.xlu1 %779  ;;  %v1785_v63 = vrot.slane %v532_v51, 9 }
 0x293   : > { %v781_v37 = vrot.slane %v780_v32, 2  ;;  %v1877_v0 = vrot.slane %v1259_v52, 9  ;;  %v811_v20 = vrot.slane %v2363_v31, 2  ;;  %v1921_v26 = vrot.slane %v1611_v19, 9 }
 0x294   : > { %488 = vrot.lane.b32.xlu0 %v1777_v22, %s2016_s17  ;;  %1251 = vrot.lane.b32.xlu1 %v1875_v33, %s2019_s29  ;;  %v622_v41 = vadd.f32 %v620_v2, %v612_v28  ;;  %s2389_s17 = sld [smem:[#allocation3 + $0x2a]]  ;;  %v495_v28 = vstv %s2391_s6  ;;  %v644_v2 = vstv %s2394_s7 }
 0x295   : > { %v782_v45 = vsel %vm426_vm12, %v780_v32, %v781_v37 }
 0x296   : > { %v784_v47 = vadd.f32 %v782_v45, %v774_v30  ;;  %v2376_v49 = vpop.permute.xlu0 %1153  ;;  %v790_v50 = vpop.permute.xlu1 %789  ;;  %v2380_v53 = vadd.f32 %v630_v43, %v622_v41  ;;  %v812_v30 = vsel %vm459_vm15, %v2363_v31, %v811_v20  ;;  %v496_v31 = vmul.f32 %v495_v28, %v2110_v34 }
 0x297   : > { %v791_v54 = vrot.slane %v790_v50, 2  ;;  %v1155_v32 = vrot.slane %v2376_v49, 2 }
 0x298   : > { %512 = vrot.lane.b32.xlu0 %v1781_v46, %s2017_s20  ;;  %1591 = vrot.lane.b32.xlu1 %v1917_v10, %s2017_s20  ;;  %s2406_s20 = sld [smem:[#allocation3 + $0x4d]]  ;;  %v645_v46 = vmul.f32 %v644_v2, %v2110_v34  ;;  %v1779_v56 = vrot.slane %v496_v31, 9 }
 0x299   : > { %v792_v35 = vsel %vm437_vm13, %v790_v50, %v791_v54  ;;  %v1156_v10 = vsel %vm437_vm13, %v2376_v49, %v1155_v32 }
 0x29a   : > { %v794_v60 = vadd.f32 %v792_v35, %v784_v47  ;;  %v1498_v61 = vpop.permute.xlu0 %1497  ;;  %v1134_v62 = vpop.permute.xlu1 %1133  ;;  %v464_v27 = vstv %s2389_s17 }
 0x29b   : > { %v1499_v4 = vrot.slane %v1498_v61, 2  ;;  %v1135_v5 = vrot.slane %v1134_v62, 2  ;;  %v465_v40 = vmul.f32 %v464_v27, %v2110_v34 }
 0x29c   : > { %536 = vrot.lane.b32.xlu0 %v1785_v63, %s2019_s29  ;;  %1263 = vrot.lane.b32.xlu1 %v1877_v0, %s2020_s27 }
 0x29d   : > { %v1500_v12 = vsel %vm415_vm11, %v1498_v61, %v1499_v4  ;;  %v1136_v13 = vsel %vm415_vm11, %v1134_v62, %v1135_v5  ;;  %v543_v62 = vstv %s2415_s8 }
 0x29e   : > { %v2402_v14 = vadd.f32 %v1500_v12, %v1491_v7  ;;  %v1138_v15 = vadd.f32 %v1136_v13, %v1127_v9  ;;  %v982_v16 = vpop.permute.xlu0 %981  ;;  %v800_v17 = vpop.permute.xlu1 %799  ;;  %v519_v50 = vstv %s2406_s20  ;;  %v544_v6 = vmul.f32 %v543_v62, %v2110_v34 }
 0x29f   : > { %v801_v22 = vrot.slane %v800_v17, 2  ;;  %v520_v57 = vmul.f32 %v519_v50, %v2110_v34  ;;  %v983_v49 = vrot.slane %v982_v16, 2 }
 0x2a0   : > { %1603 = vrot.lane.b32.xlu1 %v1919_v18, %s2018_s24  ;;  %v1787_v20 = vrot.slane %v544_v6, 9 }
 0x2a1   : > { %v802_v23 = vsel %vm448_vm14, %v800_v17, %v801_v22  ;;  %v1783_v5 = vrot.slane %v520_v57, 9  ;;  %v984_v7 = vsel %vm448_vm14, %v982_v16, %v983_v49 }
 0x2a2   : > { %v804_v24 = vadd.f32 %v802_v23, %v794_v60  ;;  %v1336_v58 = vpop.permute.xlu0 %1335  ;;  %v1144_v25 = vpop.permute.xlu1 %1143  ;;  %v1798_v60 = vrot.slane %v645_v46, 9 }
 0x2a3   : > { %v1145_v33 = vrot.slane %v1144_v25, 2  ;;  %v1337_v9 = vrot.slane %v1336_v58, 2 }
 0x2a4   : > { %1615 = vrot.lane.b32.xlu1 %v1921_v26, %s2019_s29  ;;  %v814_v37 = vadd.f32 %v812_v30, %v804_v24  ;;  %s2428_s29 = sld [smem:[#allocation3 + $0x33]] }
 0x2a5   : > { %v1146_v38 = vsel %vm426_vm12, %v1144_v25, %v1145_v33  ;;  %v1338_v23 = vsel %vm437_vm13, %v1336_v58, %v1337_v9  ;;  %v1190_v33 = vstv %s1864_s9 }
 0x2a6   : > { %v1148_v41 = vadd.f32 %v1146_v38, %v1138_v15  ;;  %v2421_v43 = vpop.permute.xlu0 %1173  ;;  %v638_v45 = vpop.permute.xlu1 %637 }
 0x2a7   : > { %v639_v47 = vrot.slane %v638_v45, 2  ;;  %v1175_v32 = vrot.slane %v2421_v43, 2 }
 0x2a8   : > { %467 = vrot.lane.b32.xlu1 %v465_v40, %s2020_s27  ;;  %v1158_v51 = vadd.f32 %v1156_v10, %v1148_v41 }
 0x2a9   : > { %v640_v52 = vsel %vm470_vm0, %v638_v45, %v639_v47  ;;  %v2458_v45 = vld [vmem:[#allocation2] sm:$0x3f]  ;;  %v1176_v31 = vsel %vm459_vm15, %v2421_v43, %v1175_v32 }
 0x2aa   : > { %v642_v54 = vadd.f32 %v640_v52, %v2380_v53  ;;  %v2433_v55 = vpop.permute.xlu0 %1517  ;;  %v972_v35 = vpop.permute.xlu1 %971  ;;  %v826_v13 = vstv %s2428_s29 }
 0x2ab   : > { %v973_v61 = vrot.slane %v972_v35, 2  ;;  %v827_v22 = vmul.f32 %v826_v13, %v2110_v34  ;;  %v1519_v46 = vrot.slane %v2433_v55, 2 }
 0x2ac   : > { %500 = vrot.lane.b32.xlu1 %v1779_v56, %s2015_s14  ;;  %v2438_v63 = vadd.f32 %v1798_v60, %v642_v54  ;;  %s1841_s14 = sld [smem:[#allocation3 + $0x34]] }
 0x2ad   : > { %v974_v0 = vsel %vm437_vm13, %v972_v35, %v973_v61  ;;  %v1821_v30 = vrot.slane %v827_v22, 9  ;;  %v1520_v43 = vsel %vm437_vm13, %v2433_v55, %v1519_v46 }
 0x2ae   : > { %v976_v1 = vadd.f32 %v974_v0, %v2341_v8  ;;  %v1184_v53 = vpop.permute.xlu0 %1183  ;;  %v1326_v4 = vpop.permute.xlu1 %1325 }
 0x2af   : > { %v1327_v12 = vrot.slane %v1326_v4, 2  ;;  %v1185_v38 = vrot.slane %v1184_v53, 2 }
 0x2b0   : > { %524 = vrot.lane.b32.xlu1 %v1783_v5, %s2018_s24  ;;  %v986_v15 = vadd.f32 %v984_v7, %v976_v1  ;;  %s1887_s24 = sld [smem:[#allocation3 + $0x36]] }
 0x2b1   : > { %v1328_v17 = vsel %vm426_vm12, %v1326_v4, %v1327_v12  ;;  %v1186_v50 = vsel %vm470_vm0, %v1184_v53, %v1185_v38 }
 0x2b2   : > { %v1330_v18 = vadd.f32 %v1328_v17, %v2361_v29  ;;  %v1528_v19 = vpop.permute.xlu0 %1527  ;;  %v820_v8 = vpop.permute.xlu1 %819  ;;  %v1008_v7 = vstv %s1841_s14 }
 0x2b3   : > { %v821_v24 = vrot.slane %v820_v8, 2  ;;  %v1529_v52 = vrot.slane %v1528_v19, 2 }
 0x2b4   : > { %548 = vrot.lane.b32.xlu1 %v1787_v20, %s2020_s27  ;;  %v1340_v16 = vadd.f32 %v1338_v23, %v1330_v18  ;;  %s1910_s27 = sld [smem:[#allocation3 + $0x37]] }
 0x2b5   : > { %v822_v25 = vsel %vm470_vm0, %v820_v8, %v821_v24  ;;  %v1530_v0 = vsel %vm448_vm14, %v1528_v19, %v1529_v52  ;;  %v1009_v19 = vmul.f32 %v2458_v45, %v1008_v7 }
 0x2b6   : > { %v824_v26 = vadd.f32 %v822_v25, %v814_v37  ;;  %v1538_v27 = vpop.permute.xlu0 %1537  ;;  %v1164_v28 = vpop.permute.xlu1 %1163  ;;  %v1191_v37 = vmul.f32 %v2458_v45, %v1190_v33 }
 0x2b7   : > { %v1165_v29 = vrot.slane %v1164_v28, 2  ;;  %v1539_v49 = vrot.slane %v1538_v27, 2 }
 0x2b8   : > { %v2453_v2 = vadd.f32 %v1821_v30, %v824_v26  ;;  %v1865_v57 = vrot.slane %v1191_v37, 9  ;;  %v1842_v26 = vrot.slane %v1009_v19, 9 }
 0x2b9   : > { %v1166_v34 = vsel %vm448_vm14, %v1164_v28, %v1165_v29  ;;  %v1372_v28 = vstv %s1887_s24 }
 0x2ba   : > { %v1168_v58 = vadd.f32 %v1166_v34, %v1158_v51  ;;  %v2456_v40 = vpop.permute.xlu0 %657  ;;  %v1508_v41 = vpop.permute.xlu1 %1507  ;;  %v1373_v33 = vmul.f32 %v2458_v45, %v1372_v28  ;;  %v1554_v34 = vstv %s1910_s27 }
 0x2bb   : > { %v1509_v10 = vrot.slane %v1508_v41, 2 }
 0x2bc   : > { %v1178_v47 = vadd.f32 %v1176_v31, %v1168_v58  ;;  %v1888_v46 = vrot.slane %v1373_v33, 9 }
 0x2bd   : > { %v1510_v51 = vsel %vm426_vm12, %v1508_v41, %v1509_v10  ;;  %v1555_v10 = vmul.f32 %v2458_v45, %v1554_v34 }
 0x2be   : > { %v1512_v54 = vadd.f32 %v1510_v51, %v2402_v14  ;;  %v2467_v35 = vpop.permute.xlu0 %839  ;;  %v992_v56 = vpop.permute.xlu1 %991  ;;  %v1188_v60 = vadd.f32 %v1186_v50, %v1178_v47  ;;  %v1540_v14 = vsel %vm459_vm15, %v1538_v27, %v1539_v49 }
 0x2bf   : > { %v993_v1 = vrot.slane %v992_v56, 2 }
 0x2c0   : > { %v1522_v61 = vadd.f32 %v1520_v43, %v1512_v54  ;;  %v2471_v62 = vadd.f32 %v1865_v57, %v1188_v60  ;;  %v1911_v57 = vrot.slane %v1555_v10, 9 }
 0x2c1   : > { %v994_v12 = vsel %vm459_vm15, %v992_v56, %v993_v1  ;;  %v659_v1 = vrot.slane %v2456_v40, 2 }
 0x2c2   : > { %v2474_v53 = vpop.permute.xlu0 %851  ;;  %v1346_v4 = vpop.permute.xlu1 %1345  ;;  %v1532_v5 = vadd.f32 %v1530_v0, %v1522_v61  ;;  %v996_v20 = vadd.f32 %v994_v12, %v986_v15 }
 0x2c3   : > { %v1347_v6 = vrot.slane %v1346_v4, 2 }
 0x2c4   : > { %v1542_v9 = vadd.f32 %v1540_v14, %v1532_v5 }
 0x2c5   : > { %v1348_v55 = vsel %vm448_vm14, %v1346_v4, %v1347_v6  ;;  %v660_v6 = vsel %vm415_vm11, %v2456_v40, %v659_v1 }
 0x2c6   : > { %v1350_v13 = vadd.f32 %v1348_v55, %v1340_v16  ;;  %v2479_v17 = vpop.permute.xlu0 %863  ;;  %v1002_v18 = vpop.permute.xlu1 %1001  ;;  %v662_v55 = vadd.f32 %v660_v6, %v2438_v63 }
 0x2c7   : > { %v1003_v8 = vrot.slane %v1002_v18, 2  ;;  %v865_v34 = vrot.slane %v2479_v17, 2 }
 0x2c9   : > { %v1004_v22 = vsel %vm470_vm0, %v1002_v18, %v1003_v8  ;;  %v866_v1 = vsel %vm437_vm13, %v2479_v17, %v865_v34 }
 0x2ca   : > { %v1006_v23 = vadd.f32 %v1004_v22, %v996_v20  ;;  %v2483_v24 = vpop.permute.xlu0 %1203  ;;  %v1356_v25 = vpop.permute.xlu1 %1355 }
 0x2cb   : > { %v1357_v27 = vrot.slane %v1356_v25, 2 }
 0x2cc   : > { %v1014_v30 = vadd.f32 %v1842_v26, %v1006_v23  ;;  %v841_v23 = vrot.slane %v2467_v35, 2 }
 0x2cd   : > { %v1358_v16 = vsel %vm459_vm15, %v1356_v25, %v1357_v27 }
 0x2ce   : > { %v706_v32 = vpop.permute.xlu0 %705  ;;  %v1366_v29 = vpop.permute.xlu1 %1365  ;;  %v1360_v58 = vadd.f32 %v1358_v16, %v1350_v13  ;;  %v853_v16 = vrot.slane %v2474_v53, 2 }
 0x2cf   : > { %v1367_v38 = vrot.slane %v1366_v29, 2  ;;  %v707_v27 = vrot.slane %v706_v32, 2 }
 0x2d1   : > { %v1368_v15 = vsel %vm470_vm0, %v1366_v29, %v1367_v38  ;;  %v842_v29 = vsel %vm415_vm11, %v2467_v35, %v841_v23 }
 0x2d2   : > { %v1370_v41 = vadd.f32 %v1368_v15, %v1360_v58  ;;  %v1034_v37 = vpop.permute.xlu0 %1033  ;;  %v1548_v31 = vpop.permute.xlu1 %1547  ;;  %v708_v58 = vsel %vm459_vm15, %v706_v32, %v707_v27 }
 0x2d3   : > { %v1549_v47 = vrot.slane %v1548_v31, 2  ;;  %v1035_v15 = vrot.slane %v1034_v37, 2 }
 0x2d4   : > { %v2489_v50 = vadd.f32 %v1888_v46, %v1370_v41  ;;  %v2524_v46 = vsub.s32 2, %v2094_v44 }
 0x2d5   : > { %v1550_v52 = vsel %vm470_vm0, %v1548_v31, %v1549_v47  ;;  %v2521_v31 = vsub.s32 0, %v2094_v44 }
 0x2d6   : > { %v1552_v51 = vadd.f32 %v1550_v52, %v1542_v9  ;;  %v2492_v54 = vpop.permute.xlu0 %1385  ;;  %v670_v56 = vpop.permute.xlu1 %669  ;;  %v854_v52 = vsel %vm426_vm12, %v2474_v53, %v853_v16 }
 0x2d7   : > { %v671_v4 = vrot.slane %v670_v56, 2 }
 0x2d8   : > { %v2494_v60 = vadd.f32 %v1911_v57, %v1552_v51 }
 0x2d9   : > { %v672_v9 = vsel %vm426_vm12, %v670_v56, %v671_v4  ;;  %v844_v56 = vadd.f32 %v842_v29, %v2453_v2 }
 0x2da   : > { %v2496_v43 = vpop.permute.xlu0 %887  ;;  %v682_v49 = vpop.permute.xlu1 %681  ;;  %v674_v8 = vadd.f32 %v672_v9, %v662_v55 }
 0x2db   : > { %v683_v7 = vrot.slane %v682_v49, 2  ;;  %v856_v53 = vadd.f32 %v854_v52, %v844_v56 }
 0x2dd   : > { %v684_v19 = vsel %vm437_vm13, %v682_v49, %v683_v7  ;;  %v868_v55 = vadd.f32 %v866_v1, %v856_v53 }
 0x2de   : > { %v2498_v61 = vpop.permute.xlu0 %1227  ;;  %v694_v0 = vpop.permute.xlu1 %693  ;;  %v686_v25 = vadd.f32 %v684_v19, %v674_v8 }
 0x2df   : > { %v695_v12 = vrot.slane %v694_v0, 2 }
 0x2e1   : > { %v696_v20 = vsel %vm448_vm14, %v694_v0, %v695_v12  ;;  %v2533_v0 = vsub.s32 4, %v2094_v44 }
 0x2e2   : > { %v2501_v5 = vpop.permute.xlu0 %1567  ;;  %v1022_v14 = vpop.permute.xlu1 %1021  ;;  %v698_v28 = vadd.f32 %v696_v20, %v686_v25 }
 0x2e3   : > { %v1023_v22 = vrot.slane %v1022_v14, 2 }
 0x2e4   : > { %v710_v47 = vadd.f32 %v708_v58, %v698_v28 }
 0x2e5   : > { %v1024_v63 = vsel %vm415_vm11, %v1022_v14, %v1023_v22 }
 0x2e6   : > { %v1058_v13 = vpop.permute.xlu0 %1057  ;;  %v876_v18 = vpop.permute.xlu1 %875  ;;  %v1026_v10 = vadd.f32 %v1024_v63, %v1014_v30  ;;  %v1036_v30 = vsel %vm426_vm12, %v1034_v37, %v1035_v15  ;;  %v889_v37 = vrot.slane %v2496_v43, 2 }
 0x2e7   : > { %v877_v35 = vrot.slane %v876_v18, 2  ;;  %v1059_v4 = vrot.slane %v1058_v13, 2 }
 0x2e8   : > { %v1038_v6 = vadd.f32 %v1036_v30, %v1026_v10  ;;  %v890_v28 = vsel %vm459_vm15, %v2496_v43, %v889_v37  ;;  %v1205_v10 = vrot.slane %v2483_v24, 2  ;;  %v414_v37 = vrot.slane %v2240_v59, 2 }
 0x2e9   : > { %v878_v9 = vsel %vm448_vm14, %v876_v18, %v877_v35  ;;  %v1060_v19 = vsel %vm448_vm14, %v1058_v13, %v1059_v4  ;;  %v1387_v18 = vrot.slane %v2492_v54, 2 }
 0x2ea   : > { %v2510_v26 = vpop.permute.xlu0 %1409  ;;  %v2512_v40 = vpop.permute.xlu1 %1215  ;;  %v880_v20 = vadd.f32 %v878_v9, %v868_v55 }
 0x2eb   : > { %v1411_v1 = vrot.slane %v2510_v26, 2 }
 0x2ec   : > { %v892_v34 = vadd.f32 %v890_v28, %v880_v20  ;;  %v1569_v20 = vrot.slane %v2501_v5, 2  ;;  %v405_v28 = vstv %s2564_s12 }
 0x2ee   : > { %v1070_v33 = vpop.permute.xlu0 %1069  ;;  %v718_v38 = vpop.permute.xlu1 %717 }
 0x2ef   : > { %v719_v41 = vrot.slane %v718_v38, 2  ;;  %v1071_v8 = vrot.slane %v1070_v33, 2 }
 0x2f1   : > { %v720_v51 = vsel %vm470_vm0, %v718_v38, %v719_v41  ;;  %v1072_v16 = vsel %vm459_vm15, %v1070_v33, %v1071_v8 }
 0x2f2   : > { %v722_v57 = vadd.f32 %v720_v51, %v710_v47  ;;  %v2530_v32 = vpop.permute.xlu0 %1421  ;;  %v1046_v49 = vpop.permute.xlu1 %1045  ;;  %v1388_v47 = vsel %vm415_vm11, %v2492_v54, %v1387_v18  ;;  %v1217_v51 = vrot.slane %v2512_v40, 2  ;;  %v1206_v54 = vsel %vm415_vm11, %v2483_v24, %v1205_v10 }
 0x2f3   : > { %v1047_v14 = vrot.slane %v1046_v49, 2  ;;  %v1423_v9 = vrot.slane %v2530_v32, 2  ;;  %v406_v10 = vmul.f32 %v2458_v45, %v405_v28 }
 0x2f4   : > { %v731_v7 = vrot.slane %v722_v57, %v2524_v46  ;;  %v727_v2 = vrot.slane %v722_v57, %v2521_v31  ;;  %v735_v25 = vrot.slane %v722_v57, %v2533_v0  ;;  %v1390_v57 = vadd.f32 %v1388_v47, %v2489_v50 }
 0x2f5   : > { %v1048_v12 = vsel %vm437_vm13, %v1046_v49, %v1047_v14  ;;  %v1218_v50 = vsel %vm426_vm12, %v2512_v40, %v1217_v51 }
 0x2f6   : > { %v1050_v44 = vadd.f32 %v1048_v12, %v1038_v6  ;;  %738 = vrot.lane.b32.xlu1 %v731_v7, %s2021_s10  ;;  %736 = vrot.lane.b32.xlu0 %v727_v2, %s2021_s10  ;;  %v1398_v17 = vpop.permute.xlu1 %1397  ;;  %v1082_v23 = vpop.permute.xlu0 %1081  ;;  %v1208_v6 = vadd.f32 %v1206_v54, %v2471_v62  ;;  %v1229_v7 = vrot.slane %v2498_v61, 2  ;;  %v1412_v2 = vsel %vm437_vm13, %v2510_v26, %v1411_v1 }
 0x2f7   : > { %v1083_v63 = vrot.slane %v1082_v23, 2  ;;  %v1399_v13 = vrot.slane %v1398_v17, 2 }
 0x2f8   : > { %v1062_v22 = vadd.f32 %v1060_v19, %v1050_v44  ;;  %v1220_v55 = vadd.f32 %v1218_v50, %v1208_v6  ;;  %v1230_v19 = vsel %vm437_vm13, %v2498_v61, %v1229_v7  ;;  %v416_v61 = vsel %vm415_vm11, %v2240_v59, %v414_v37 }
 0x2f9   : > { %v1084_v52 = vsel %vm470_vm0, %v1082_v23, %v1083_v63  ;;  %v1400_v56 = vsel %vm426_vm12, %v1398_v17, %v1399_v13  ;;  %v436_v59 = vrot.slane %v2274_v11, 2  ;;  %v458_v7 = vrot.slane %v2312_v36, 2 }
 0x2fa   : > { %740 = vrot.lane.b32.xlu0 %v735_v25, %s2021_s10  ;;  %v900_v27 = vpop.permute.xlu1 %899  ;;  %v1074_v38 = vadd.f32 %v1072_v16, %v1062_v22  ;;  %v1402_v30 = vadd.f32 %v1400_v56, %v1390_v57  ;;  %v1434_v4 = vpop.permute.xlu0 %1433  ;;  %v1424_v22 = vsel %vm448_vm14, %v2530_v32, %v1423_v9  ;;  %v1570_v32 = vsel %vm415_vm11, %v2501_v5, %v1569_v20 }
 0x2fb   : > { %v901_v29 = vrot.slane %v900_v27, 2  ;;  %v1435_v23 = vrot.slane %v1434_v4, 2  ;;  %v418_v5 = vadd.f32 %v416_v61, %v406_v10  ;;  %v1572_v56 = vadd.f32 %v1570_v32, %v2494_v60 }
 0x2fc   : > { %v1086_v35 = vadd.f32 %v1084_v52, %v1074_v38  ;;  %v1414_v17 = vadd.f32 %v1412_v2, %v1402_v30  ;;  %v425_v38 = vrot.slane %v2258_v3, 2  ;;  %v447_v30 = vrot.slane %v2298_v21, 2 }
 0x2fd   : > { %v902_v58 = vsel %vm470_vm0, %v900_v27, %v901_v29  ;;  %v1232_v27 = vadd.f32 %v1230_v19, %v1220_v55  ;;  %v438_v60 = vsel %vm437_vm13, %v2274_v11, %v436_v59 }
 0x2fe   : > { %v904_v15 = vadd.f32 %v902_v58, %v892_v34  ;;  %v1240_v41 = vpop.permute.xlu1 %1239  ;;  %v1091_v53 = vrot.slane %v1086_v35, %v2521_v31  ;;  %v1095_v44 = vrot.slane %v1086_v35, %v2524_v46  ;;  %v1099_v40 = vrot.slane %v1086_v35, %v2533_v0  ;;  %v1446_v8 = vpop.permute.xlu0 %1445 }
 0x2ff   : > { %v1241_v12 = vrot.slane %v1240_v41, 2  ;;  %v1426_v18 = vadd.f32 %v1424_v22, %v1414_v17  ;;  %v1447_v16 = vrot.slane %v1446_v8, 2  ;;  %v1436_v58 = vsel %vm459_vm15, %v1434_v4, %v1435_v23 }
 0x300   : > { %v913_v43 = vrot.slane %v904_v15, %v2524_v46  ;;  %v909_v33 = vrot.slane %v904_v15, %v2521_v31  ;;  %v917_v14 = vrot.slane %v904_v15, %v2533_v0  ;;  %v427_v1 = vsel %vm426_vm12, %v2258_v3, %v425_v38 }
 0x301   : > { %v1242_v25 = vsel %vm448_vm14, %v1240_v41, %v1241_v12  ;;  %v1438_v47 = vadd.f32 %v1436_v58, %v1426_v18  ;;  %v429_v3 = vadd.f32 %v427_v1, %v418_v5  ;;  %v449_v55 = vsel %vm448_vm14, %v2298_v21, %v447_v30 }
 0x302   : > { %920 = vrot.lane.b32.xlu0 %v913_v43, %s2022_s11  ;;  %918 = vrot.lane.b32.xlu1 %v909_v33, %s2022_s11  ;;  %v1580_v49 = vpop.permute.xlu1 %1579  ;;  %v1244_v34 = vadd.f32 %v1242_v25, %v1232_v27  ;;  %v1628_v52 = vpop.permute.xlu0 %1627  ;;  %v1448_v43 = vsel %vm470_vm0, %v1446_v8, %v1447_v16  ;;  %v460_v8 = vsel %vm459_vm15, %v2312_v36, %v458_v7 }
 0x303   : > { %v1581_v63 = vrot.slane %v1580_v49, 2 }
 0x305   : > { %v1582_v33 = vsel %vm426_vm12, %v1580_v49, %v1581_v63 }
 0x306   : > { %1100 = vrot.lane.b32.xlu0 %v1091_v53, %s2023_s13  ;;  %922 = vrot.lane.b32.xlu1 %v917_v14, %s2022_s11  ;;  %v1252_v24 = vpop.permute.xlu1 %1251  ;;  %v1450_v53 = vadd.f32 %v1448_v43, %v1438_v47  ;;  %v1584_v50 = vadd.f32 %v1582_v33, %v1572_v56  ;;  %v489_v2 = vpop.permute.xlu0 %488 }
 0x307   : > { %v1253_v62 = vrot.slane %v1252_v24, 2 }
 0x308   : > { %v1455_v19 = vrot.slane %v1450_v53, %v2521_v31  ;;  %v1459_v28 = vrot.slane %v1450_v53, %v2524_v46  ;;  %v1463_v16 = vrot.slane %v1450_v53, %v2533_v0 }
 0x309   : > { %v1254_v29 = vsel %vm459_vm15, %v1252_v24, %v1253_v62  ;;  %v440_v62 = vadd.f32 %v438_v60, %v429_v3 }
 0x30a   : > { %1104 = vrot.lane.b32.xlu0 %v1099_v40, %s2023_s13  ;;  %1102 = vrot.lane.b32.xlu1 %v1095_v44, %s2023_s13  ;;  %v1592_v26 = vpop.permute.xlu1 %1591  ;;  %v1256_v35 = vadd.f32 %v1254_v29, %v1244_v34  ;;  %v1629_v44 = vrot.slane %v1628_v52, 2  ;;  %v475_v40 = vstv %s2590_s18  ;;  %v513_v63 = vpop.permute.xlu0 %512  ;;  %v490_v29 = vrot.slane %v489_v2, 2 }
 0x30b   : > { %v1593_v15 = vrot.slane %v1592_v26, 2  ;;  %v451_v20 = vadd.f32 %v449_v55, %v440_v62  ;;  %v476_v21 = vmul.f32 %v2458_v45, %v475_v40  ;;  %v514_v10 = vrot.slane %v513_v63, 2 }
 0x30c   : > { %v1630_v25 = vsel %vm470_vm0, %v1628_v52, %v1629_v44 }
 0x30d   : > { %v1594_v4 = vsel %vm437_vm13, %v1592_v26, %v1593_v15  ;;  %v462_v27 = vadd.f32 %v460_v8, %v451_v20  ;;  %v1775_v38 = vrot.slane %v476_v21, 9  ;;  %v515_v5 = vsel %vm437_vm13, %v513_v63, %v514_v10 }
 0x30e   : > { %v1264_v13 = vpop.permute.xlu1 %1263  ;;  %v1596_v9 = vadd.f32 %v1594_v4, %v1584_v50  ;;  %v537_v47 = vpop.permute.xlu0 %536 }
 0x30f   : > { %v1265_v41 = vrot.slane %v1264_v13, 2  ;;  %v538_v56 = vrot.slane %v537_v47, 2 }
 0x311   : > { %v1266_v51 = vsel %vm470_vm0, %v1264_v13, %v1265_v41  ;;  %v491_v41 = vsel %vm415_vm11, %v489_v2, %v490_v29  ;;  %v368_v2 = vand.u32 127, %v268_v42  ;;  %vm1106_vm11 = vcmask 1022976  }
 0x312   : > { %v1268_v57 = vadd.f32 %v1266_v51, %v1256_v35  ;;  %v1604_v54 = vpop.permute.xlu1 %1603 }
 0x313   : > { %v1605_v14 = vrot.slane %v1604_v54, 2  ;;  %v369_v55 = vadd.s32 128, %v368_v2  ;;  %v374_v44 = vand.u32 15, %v368_v2 }
 0x314   : > { %v1273_v49 = vrot.slane %v1268_v57, %v2521_v31  ;;  %v1277_v6 = vrot.slane %v1268_v57, %v2524_v46  ;;  %v1281_v11 = vrot.slane %v1268_v57, %v2533_v0 }
 0x315   : > { %v1606_v24 = vsel %vm448_vm14, %v1604_v54, %v1605_v14  ;;  %v539_v14 = vsel %vm459_vm15, %v537_v47, %v538_v56  ;;  %vm569_vm1 = vcmp.ge.s32.totalorder %v374_v44, 2  ;;  %vm394_vm3 = vcmp.ge.s32.totalorder %v374_v44, 3 }
 0x316   : > { %1284 = vrot.lane.b32.xlu0 %v1277_v6, %s2024_s19  ;;  %1282 = vrot.lane.b32.xlu1 %v1273_v49, %s2024_s19  ;;  %v1616_v12 = vpop.permute.xlu1 %1615  ;;  %v1608_v37 = vadd.f32 %v1606_v24, %v1596_v9  ;;  %vm751_vm5 = vcmp.ge.s32.totalorder %v374_v44, 1  ;;  %vm1117_vm9 = vcmp.le.s32.totalorder %v374_v44, 14 }
 0x317   : > { %v1617_v17 = vrot.slane %v1616_v12, 2 }
 0x319   : > { %v1618_v26 = vsel %vm459_vm15, %v1616_v12, %v1617_v17  ;;  %v2632_v17 = vand.u32 15, %v369_v55 }
 0x31a   : > { %v1620_v22 = vadd.f32 %v1618_v26, %v1608_v37  ;;  %1464 = vrot.lane.b32.xlu0 %v1455_v19, %s2025_s21  ;;  %1286 = vrot.lane.b32.xlu1 %v1281_v11, %s2024_s19  ;;  %v468_v23 = vpop.permute.xlu1 %467  ;;  %v1766_v37 = vsel %vm394_vm3, 1.0, %v2011_v39 }
 0x31b   : > { %v469_v18 = vrot.slane %v468_v23, 2  ;;  %vm570_vm4 = vcmp.ge.s32.totalorder %v2632_v17, 2  ;;  %vm395_vm7 = vcmp.ge.s32.totalorder %v2632_v17, 3  ;;  %vm752_vm8 = vcmp.ge.s32.totalorder %v2632_v17, 1 }
 0x31c   : > { %v1632_v36 = vadd.f32 %v1630_v25, %v1620_v22  ;;  %v1789_v26 = vsel %vm570_vm4, 1.0, %v2011_v39  ;;  %v1811_v22 = vsel %vm751_vm5, 1.0, %v2011_v39  ;;  %v1767_v25 = vsel %vm395_vm7, 1.0, %v2011_v39 }
 0x31d   : > { %v471_v61 = vsel %vm470_vm0, %v468_v23, %v469_v18  ;;  %v1812_v18 = vsel %vm752_vm8, 1.0, %v2011_v39  ;;  %vm1118_vm13 = vcmp.le.s32.totalorder %v2632_v17, 14  ;;  %vm1300_vm15 = vcmp.le.s32.totalorder %v2632_v17, 13 }
 0x31e   : > { %v473_v34 = vadd.f32 %v471_v61, %v462_v27  ;;  %1468 = vrot.lane.b32.xlu0 %v1463_v16, %s2025_s21  ;;  %1466 = vrot.lane.b32.xlu1 %v1459_v28, %s2025_s21  ;;  %v501_v13 = vpop.permute.xlu1 %500  ;;  %v1641_v58 = vrot.slane %v1632_v36, %v2524_v46  ;;  %v1637_v15 = vrot.slane %v1632_v36, %v2521_v31  ;;  %v1855_v61 = vsel %vm1117_vm9, 1.0, %v2011_v39 }
 0x31f   : > { %v502_v45 = vrot.slane %v501_v13, 2  ;;  %v1645_v51 = vrot.slane %v1632_v36, %v2533_v0 }
 0x320   : > { %v481_v32 = vadd.f32 %v1775_v38, %v473_v34 }
 0x321   : > { %v503_v59 = vsel %vm426_vm12, %v501_v13, %v502_v45  ;;  %vm1299_vm12 = vcmp.le.s32.totalorder %v374_v44, 13 }
 0x322   : > { %v493_v52 = vadd.f32 %v491_v41, %v481_v32  ;;  %1648 = vrot.lane.b32.xlu0 %v1641_v58, %s2026_s22  ;;  %1646 = vrot.lane.b32.xlu1 %v1637_v15, %s2026_s22  ;;  %v525_v35 = vpop.permute.xlu1 %524  ;;  %v1878_v58 = vsel %vm1299_vm12, 1.0, %v2011_v39 }
 0x323   : > { %v526_v43 = vrot.slane %v525_v35, 2 }
 0x324   : > { %v505_v33 = vadd.f32 %v503_v59, %v493_v52 }
 0x325   : > { %v527_v1 = vsel %vm448_vm14, %v525_v35, %v526_v43  ;;  %vm1470_vm14 = vcmask 1006592   ;;  %v1856_v35 = vsel %vm1118_vm13, 1.0, %v2011_v39 }
 0x326   : > { %v517_v57 = vadd.f32 %v515_v5, %v505_v33  ;;  %1650 = vrot.lane.b32.xlu1 %v1645_v51, %s2026_s22  ;;  %v549_v54 = vpop.permute.xlu1 %548 }
 0x327   : > { %v550_v30 = vrot.slane %v549_v54, 2 }
 0x328   : > { %v529_v4 = vadd.f32 %v527_v1, %v517_v57  ;;  %v1879_v57 = vsel %vm1300_vm15, 1.0, %v2011_v39 }
 0x329   : > { %v551_v50 = vsel %vm470_vm0, %v549_v54, %v550_v30  ;;  %vm1481_vm0 = vcmp.le.s32.totalorder %v374_v44, 12 }
 0x32a   : > { %v541_v53 = vadd.f32 %v539_v14, %v529_v4  ;;  %v1901_v1 = vsel %vm1481_vm0, 1.0, %v2011_v39 }
 0x32c   : > { %v553_v49 = vadd.f32 %v551_v50, %v541_v53 }
 0x32e   : > { %v562_v6 = vrot.slane %v553_v49, %v2524_v46  ;;  %v1788_v46 = vsel %vm569_vm1, 1.0, %v2011_v39  ;;  %v558_v42 = vrot.slane %v553_v49, %v2521_v31  ;;  %vm1652_vm1 = vcmask 998400  }
 0x330   : > { %v565_v28 = vmul.f32 %v1766_v37, %v558_v42  ;;  %v566_v13 = vmul.f32 %v1767_v25, %v562_v6 }
 0x368   : > { %v737_v60 = vpop.permute.xlu0 %736  ;;  %v739_v0 = vpop.permute.xlu1 %738 }
 0x369   : > { %v743_v11 = vsel %vm742_vm2, %v737_v60, %v739_v0 }
 0x36a   : > { %v747_v23 = vmul.f32 %v1788_v46, %v743_v11 }
 0x36c   : > { %v741_v7 = vpop.permute.xlu0 %740  ;;  %v749_v34 = vadd.f32 %v747_v23, %v565_v28 }
 0x36d   : > { %v744_v20 = vsel %vm742_vm2, %v739_v0, %v741_v7  ;;  %vm1482_vm2 = vcmp.le.s32.totalorder %v2632_v17, 12 }
 0x36e   : > { %v748_v16 = vmul.f32 %v1789_v26, %v744_v20  ;;  %v1902_v7 = vsel %vm1482_vm2, 1.0, %v2011_v39 }
 0x370   : > { %v750_v15 = vadd.f32 %v748_v16, %v566_v13 }
 0x374   : > { %v921_v24 = vpop.permute.xlu0 %920  ;;  %v919_v3 = vpop.permute.xlu1 %918 }
 0x375   : > { %v925_v21 = vsel %vm924_vm6, %v919_v3, %v921_v24 }
 0x376   : > { %v929_v63 = vmul.f32 %v1811_v22, %v925_v21 }
 0x378   : > { %v1101_v9 = vpop.permute.xlu0 %1100  ;;  %v923_v12 = vpop.permute.xlu1 %922  ;;  %v931_v41 = vadd.f32 %v929_v63, %v749_v34 }
 0x379   : > { %v926_v27 = vsel %vm924_vm6, %v921_v24, %v923_v12 }
 0x37a   : > { %v930_v45 = vmul.f32 %v1812_v18, %v926_v27 }
 0x37c   : > { %v1105_v40 = vpop.permute.xlu0 %1104  ;;  %v1103_v62 = vpop.permute.xlu1 %1102  ;;  %v932_v33 = vadd.f32 %v930_v45, %v750_v15 }
 0x37d   : > { %v1107_v32 = vsel %vm1106_vm11, %v1101_v9, %v1103_v62  ;;  %v1108_v56 = vsel %vm1106_vm11, %v1103_v62, %v1105_v40 }
 0x37e   : > { %v1113_v51 = vadd.f32 %v1107_v32, %v931_v41  ;;  %v1114_v49 = vadd.f32 %v1108_v56, %v932_v33 }
 0x388   : > { %v1285_v19 = vpop.permute.xlu0 %1284  ;;  %v1283_v8 = vpop.permute.xlu1 %1282 }
 0x389   : > { %v1289_v38 = vsel %vm1288_vm10, %v1283_v8, %v1285_v19 }
 0x38a   : > { %v1293_v10 = vmul.f32 %v1855_v61, %v1289_v38 }
 0x38c   : > { %v1465_v36 = vpop.permute.xlu0 %1464  ;;  %v1287_v29 = vpop.permute.xlu1 %1286  ;;  %v1295_v30 = vadd.f32 %v1293_v10, %v1113_v51 }
 0x38d   : > { %v1290_v59 = vsel %vm1288_vm10, %v1285_v19, %v1287_v29 }
 0x38e   : > { %v1294_v4 = vmul.f32 %v1856_v35, %v1290_v59 }
 0x390   : > { %v1469_v47 = vpop.permute.xlu0 %1468  ;;  %v1467_v52 = vpop.permute.xlu1 %1466  ;;  %v1296_v24 = vadd.f32 %v1294_v4, %v1114_v49 }
 0x391   : > { %v1471_v43 = vsel %vm1470_vm14, %v1465_v36, %v1467_v52  ;;  %v1472_v54 = vsel %vm1470_vm14, %v1467_v52, %v1469_v47 }
 0x392   : > { %v1475_v5 = vmul.f32 %v1878_v58, %v1471_v43  ;;  %v1476_v6 = vmul.f32 %v1879_v57, %v1472_v54 }
 0x394   : > { %v1649_v14 = vpop.permute.xlu0 %1648  ;;  %v1647_v53 = vpop.permute.xlu1 %1646  ;;  %v1477_v60 = vadd.f32 %v1475_v5, %v1295_v30  ;;  %v1478_v12 = vadd.f32 %v1476_v6, %v1296_v24 }
 0x395   : > { %v1653_v50 = vsel %vm1652_vm1, %v1647_v53, %v1649_v14 }
 0x396   : > { %v1657_v0 = vmul.f32 %v1901_v1, %v1653_v50 }
 0x398   : > { %v1659_v3 = vadd.f32 %v1657_v0, %v1477_v60  ;;  %v1651_v2 = vpop.permute.xlu1 %1650 }
 0x399   : > { %v1654_v9 = vsel %vm1652_vm1, %v1649_v14, %v1651_v2 }
 0x39a   : > { %v1924_v55 = vmul.f32 -1.442695, %v1659_v3  ;;  %v1658_v44 = vmul.f32 %v1902_v7, %v1654_v9 }
 0x39c   : > { %1973 = vpow2.f32 %v1924_v55  ;;  %v1660_v40 = vadd.f32 %v1658_v44, %v1478_v12 }
 0x39e   : > { %v1925_v17 = vmul.f32 -1.442695, %v1660_v40 }
 0x3a0   : > { %1975 = vpow2.f32 %v1925_v17 }
 0x3a6   : > { %v1974_v62 = vpop.eup %1973 }
 0x3a7   : > { %v1667_v46 = vadd.f32 1.0, %v1974_v62 }
 0x3a9   : > { %1977 = vrcp.f32 %v1667_v46 }
 0x3aa   : > { %v1976_v11 = vpop.eup %1975 }
 0x3ab   : > { %v1668_v42 = vadd.f32 1.0, %v1976_v11 }
 0x3ad   : > { %1979 = vrcp.f32 %v1668_v42 }
 0x3b3   : > { %v1978_v39 = vpop.eup %1977 }
 0x3b4   : > { %v1676_v19 = vrot.slane %v1978_v39, %v2521_v31 }
 0x3b7   : > { %v1980_v37 = vpop.eup %1979 }
 0x3b8   : > { %v1680_v8 = vrot.slane %v1980_v37, %v2521_v31 }
 0x3ba   : > { %v1683_v26 = vcombine.low %v1676_v19, %v1680_v8 }
 0x3bc   : > { %v1685_v20 = vmul.f32 %v1683_v26, %v2097_v48 }
 0x3be   : > { %1686 = vst [vmem:[%s211_s28] sm:$0x77] %v1685_v20 }
 0x3bf PF: > { %s15_s15 = sadd.s32 1, %s2007_s15  }
 0x3c0   : > { %p12_p1 = scmp.ge.s32.totalorder %s15_s15, 4  }
 0x3c2   :  { %14 = sbr.rel (!%p12_p1) target bundleno = 1 (0x1), region = 72 }
 0x3c9   :  { %1708 = vsyncpa [#allocation4], 1 }
 0x3ca   :  { %1710 = vsyncpa [#allocation4 + $0x1], 1 }

</bundles_post_ra>
